<compile_context>
chip_gen: v5e
topology: v5e:2x2
jax: 0.10.0
libtpu: 0.0.40
codegen_flags: <defaults>
</compile_context>

<pallas_src>
import math
from functools import partial

import jax
import jax.numpy as jnp
from jax.experimental import pallas as pl
from jax.experimental.pallas import tpu as pltpu


# ----------------------------------------------------------------------------
# Config (small synthetic sizes consistent with the module's forward)
# ----------------------------------------------------------------------------
class Config:
    sr = 16000
    # synthetic wav2vec2
    w2v2_channels = 32
    W2V2_STRIDE = 4
    # linguistic encoder
    ling_hiddens = 32
    ling_heads = 2
    ling_ffn = 64
    ling_blocks = 1
    # style retriever (cross attention)
    styles = 16
    ret_heads = 2
    ret_ffn = 32
    ret_blocks = 1
    prototypes = 4
    # decoders
    contexts = 32
    embeds = 16
    fst_heads = 2
    fst_ffn = 64
    fst_blocks = 1
    rst_heads = 2
    rst_ffn = 64
    rst_blocks = 1
    encodecs = 64          # codebook size (logit classes)
    pe = 16
    timesteps = 3          # 1 autoregressive pass + (timesteps - 1) refinement passes
    # synthetic encodec
    ENCODEC_DIM = 8
    ENCODEC_STRIDES = 4


_ROW_TILE = 512            # M-tile for row-gridded linears


# ----------------------------------------------------------------------------
# Pallas kernels
# ----------------------------------------------------------------------------
def _linear_kernel(x_ref, w_ref, b_ref, o_ref):
    # o = x @ w + b ; bf16 MXU path, f32 accumulation.
    o_ref[...] = (
        jnp.dot(x_ref[...].astype(jnp.bfloat16), w_ref[...].astype(jnp.bfloat16),
                preferred_element_type=jnp.float32)
        + b_ref[...]
    )


def _ffn_kernel(x_ref, w1_ref, b1_ref, w2_ref, b2_ref, o_ref):
    # o = relu(x @ w1 + b1) @ w2 + b2 fused in one kernel (hidden stays in vregs).
    h = (jnp.dot(x_ref[...].astype(jnp.bfloat16), w1_ref[...].astype(jnp.bfloat16),
                 preferred_element_type=jnp.float32)
         + b1_ref[...])
    h = jnp.maximum(h, 0.0)
    o_ref[...] = (
        jnp.dot(h.astype(jnp.bfloat16), w2_ref[...].astype(jnp.bfloat16),
                preferred_element_type=jnp.float32)
        + b2_ref[...]
    )


def _attn_kernel(klen_ref, q_ref, k_ref, v_ref, o_ref, *, heads, dh):
    """All heads of one batch element. Key-validity mask built in-kernel from
    the prefetched length scalar; scale is pre-folded into the q projection."""
    b = pl.program_id(0)
    n = klen_ref[b]
    tk = k_ref.shape[1]
    col = jax.lax.broadcasted_iota(jnp.int32, (1, tk), 1)
    bias = jnp.where(col < n, jnp.float32(0.0), jnp.float32(-1e9))   # [1, Tk]
    q = q_ref[0]            # [Tq, H*Dh]
    k = k_ref[0]            # [Tk, H*Dh]
    v = v_ref[0]
    outs = []
    for h in range(heads):
        sl = slice(h * dh, (h + 1) * dh)
        qs = q[:, sl].astype(jnp.bfloat16)
        ks = k[:, sl].astype(jnp.bfloat16)
        vs = v[:, sl].astype(jnp.bfloat16)
        s = jax.lax.dot_general(qs, ks, (((1,), (1,)), ((), ())),
                                preferred_element_type=jnp.float32)   # [Tq, Tk]
        s = s + bias
        s = s - jnp.max(s, axis=-1, keepdims=True)
        p = jnp.exp(s)
        p = p * pl.reciprocal(jnp.sum(p, axis=-1, keepdims=True), approx=True)
        outs.append(jnp.dot(p.astype(jnp.bfloat16), vs,
                            preferred_element_type=jnp.float32))
    o_ref[0] = jnp.concatenate(outs, axis=-1)       # single lane-dense store


# ----------------------------------------------------------------------------
# Kernel wrappers
# ----------------------------------------------------------------------------
def _flat_rows(x):
    m = 1
    for d in x.shape[:-1]:
        m *= int(d)
    return x.reshape(m, x.shape[-1]), m


def linear(x, p):
    """x: [..., K] @ w[K, N] + b[N]."""
    w, b = p["w"], p["b"]
    orig = x.shape
    K = orig[-1]
    N = w.shape[1]
    x2, M = _flat_rows(x)
    b2 = b.reshape(1, N)
    if M <= _ROW_TILE:
        out = pl.pallas_call(
            _linear_kernel,
            out_shape=jax.ShapeDtypeStruct((M, N), jnp.float32),
        )(x2, w, b2)
    else:
        TM = _ROW_TILE
        Mp = ((M + TM - 1) // TM) * TM
        xp = jnp.pad(x2, ((0, Mp - M), (0, 0)))
        out = pl.pallas_call(
            _linear_kernel,
            grid=(Mp // TM,),
            in_specs=[pl.BlockSpec((TM, K), lambda i: (i, 0)),
                      pl.BlockSpec((K, N), lambda i: (0, 0)),
                      pl.BlockSpec((1, N), lambda i: (0, 0))],
            out_specs=pl.BlockSpec((TM, N), lambda i: (i, 0)),
            out_shape=jax.ShapeDtypeStruct((Mp, N), jnp.float32),
            compiler_params=pltpu.CompilerParams(dimension_semantics=("parallel",)),
        )(xp, w, b2)
        out = out[:M]
    return out.reshape(*orig[:-1], N)


def ffn(x, p):
    """Fused relu(x @ w1 + b1) @ w2 + b2."""
    orig = x.shape
    K = orig[-1]
    F = p["w1"].shape[1]
    N = p["w2"].shape[1]
    x2, M = _flat_rows(x)
    b1 = p["b1"].reshape(1, F)
    b2 = p["b2"].reshape(1, N)
    if M <= _ROW_TILE:
        out = pl.pallas_call(
            _ffn_kernel,
            out_shape=jax.ShapeDtypeStruct((M, N), jnp.float32),
        )(x2, p["w1"], b1, p["w2"], b2)
    else:
        TM = _ROW_TILE
        Mp = ((M + TM - 1) // TM) * TM
        xp = jnp.pad(x2, ((0, Mp - M), (0, 0)))
        out = pl.pallas_call(
            _ffn_kernel,
            grid=(Mp // TM,),
            in_specs=[pl.BlockSpec((TM, K), lambda i: (i, 0)),
                      pl.BlockSpec((K, F), lambda i: (0, 0)),
                      pl.BlockSpec((1, F), lambda i: (0, 0)),
                      pl.BlockSpec((F, N), lambda i: (0, 0)),
                      pl.BlockSpec((1, N), lambda i: (0, 0))],
            out_specs=pl.BlockSpec((TM, N), lambda i: (i, 0)),
            out_shape=jax.ShapeDtypeStruct((Mp, N), jnp.float32),
            compiler_params=pltpu.CompilerParams(dimension_semantics=("parallel",)),
        )(xp, p["w1"], b1, p["w2"], b2)
        out = out[:M]
    return out.reshape(*orig[:-1], N)


def attention(q, k, v, klen, heads):
    """q: [B, Tq, D], k/v: [B, Tk, D], klen: [B] valid-key lengths (int)."""
    B, Tq, D = q.shape
    Tk = k.shape[1]
    dh = D // heads
    grid_spec = pltpu.PrefetchScalarGridSpec(
        num_scalar_prefetch=1,
        grid=(B,),
        in_specs=[
            pl.BlockSpec((1, Tq, D), lambda b, klen_ref: (b, 0, 0)),
            pl.BlockSpec((1, Tk, D), lambda b, klen_ref: (b, 0, 0)),
            pl.BlockSpec((1, Tk, D), lambda b, klen_ref: (b, 0, 0)),
        ],
        out_specs=pl.BlockSpec((1, Tq, D), lambda b, klen_ref: (b, 0, 0)),
    )
    return pl.pallas_call(
        partial(_attn_kernel, heads=heads, dh=dh),
        grid_spec=grid_spec,
        out_shape=jax.ShapeDtypeStruct((B, Tq, D), jnp.float32),
        compiler_params=pltpu.CompilerParams(dimension_semantics=("parallel",)),
    )(klen.astype(jnp.int32), q, k, v)


# ----------------------------------------------------------------------------
# JAX glue modules built on the Pallas kernels
# ----------------------------------------------------------------------------
def layer_norm(x, p, eps=1e-5):
    mu = jnp.mean(x, axis=-1, keepdims=True)
    var = jnp.var(x, axis=-1, keepdims=True)
    return (x - mu) * jax.lax.rsqrt(var + eps) * p["g"] + p["b"]


def self_mha(p, x, klen, heads):
    """Self attention with fused QKV projection. x: [B, T, D]."""
    D = x.shape[-1]
    qkv = linear(x, p["wqkv"])                       # [B, T, 3D]
    q, k, v = qkv[..., :D], qkv[..., D:2 * D], qkv[..., 2 * D:]
    out = attention(q, k, v, klen, heads)
    return linear(out, p["wo"])


def cross_mha(p, xq, kv, klen, heads):
    """Cross attention; kv is the precomputed fused K/V projection [B, Tk, 2*Dq]."""
    Dq = xq.shape[-1]
    q = linear(xq, p["wq"])
    k, v = kv[..., :Dq], kv[..., Dq:]
    out = attention(q, k, v, klen, heads)
    return linear(out, p["wo"])


def wav2vec2_synth(p, cfg, audio, audlen):
    # TODO(synk): pretrained Wav2Vec2 has no in-script equivalent; replaced by a
    # deterministic strided framing + Pallas linear projections (spk/ling fused).
    B, T = audio.shape
    S = T // cfg.W2V2_STRIDE
    frames = audio.reshape(B, S, cfg.W2V2_STRIDE)
    feat = jnp.tanh(linear(frames, p["feat"]))
    sl = linear(feat, p["spk_ling"])                 # [B, S, 2C]
    C = cfg.w2v2_channels
    spk, ling = sl[..., :C], sl[..., C:]
    framelen = jnp.ceil(audlen / cfg.W2V2_STRIDE).astype(jnp.int32)
    mask = (jnp.arange(S)[None] < framelen[:, None]).astype(jnp.float32)
    return spk, ling, framelen, mask


def linguistic_encoder(p, cfg, ling, framelen, mask):
    x = linear(ling, p["proj"])
    for blk in p["blocks"]:
        hn = layer_norm(x, blk["ln1"])
        x = x + self_mha(blk["attn"], hn, framelen, cfg.ling_heads)
        hn = layer_norm(x, blk["ln2"])
        x = x + ffn(hn, blk["ffn"])
    return x * mask[..., None]


def retriever_ca(p, cfg, spk, framelen):
    B = spk.shape[0]
    q = jnp.broadcast_to(p["prototypes"][None], (B, cfg.prototypes, cfg.styles))
    for blk in p["blocks"]:
        kv = linear(spk, blk["attn"]["wkv"])         # [B, S, 2*styles]
        hn = layer_norm(q, blk["ln1"])
        q = q + cross_mha(blk["attn"], hn, kv, framelen, cfg.ret_heads)
        hn = layer_norm(q, blk["ln2"])
        q = q + ffn(hn, blk["ffn"])
    return q


def decoder_cross_kv(p, ling):
    """Loop-invariant cross-attention K/V projections of the linguistic features."""
    return [linear(ling, blk["cross_attn"]["wkv"]) for blk in p["blocks"]]


def decoder_full(p, heads, x, cross_kv_list, style_cond, step_cond, self_klen, cross_klen):
    """Full (non-autoregressive) decode: x [B, L, contexts] -> logits [B, L, encodecs]."""
    h = linear(x, p["proj_in"]) + step_cond + style_cond
    for blk, ckv in zip(p["blocks"], cross_kv_list):
        hn = layer_norm(h, blk["ln1"])
        h = h + self_mha(blk["self_attn"], hn, self_klen, heads)
        hn = layer_norm(h, blk["ln2"])
        h = h + cross_mha(blk["cross_attn"], hn, ckv, cross_klen, heads)
        hn = layer_norm(h, blk["ln3"])
        h = h + ffn(hn, blk["ffn"])
    return linear(layer_norm(h, p["ln_out"]), p["proj_out"])


def embed_code(params, codebook, code):
    """code: [B, L] int -> [B, L, contexts] via codebook lookup + proj_code."""
    emb = jnp.take(codebook, code, axis=0)
    return linear(emb, params["proj_code"])


def sinusoidal_pe(n, dim):
    pos = jnp.arange(n)[:, None].astype(jnp.float32)
    i = jnp.arange(dim // 2)[None].astype(jnp.float32)
    freq = jnp.exp(-math.log(10000.0) * (2.0 * i / dim))
    ang = pos * freq
    return jnp.concatenate([jnp.sin(ang), jnp.cos(ang)], axis=-1)


def steps_mlp(p, cfg):
    pe = sinusoidal_pe(cfg.timesteps - 1, cfg.pe)
    h = jax.nn.relu(linear(pe, p["l1"]))
    return jax.nn.relu(linear(h, p["l2"]))           # [timesteps-1, embeds]


def encodec_decode_synth(params, cfg, codes):
    # TODO(synk): pretrained Encodec SEANet decoder has no in-script equivalent;
    # replaced with codebook-sum + Pallas linear upsampling.
    B, nq, clen = codes.shape
    emb = jnp.zeros((B, clen, cfg.ENCODEC_DIM), jnp.float32)
    for q in range(nq):
        emb = emb + jnp.take(params["codebooks"][q], codes[:, q], axis=0)
    frames = linear(emb, params["enc_dec"])          # [B, clen, strides]
    return frames.reshape(B, clen * cfg.ENCODEC_STRIDES)


# ----------------------------------------------------------------------------
# Incremental autoregressive first-quantizer pass (KV cache + lax.scan)
# ----------------------------------------------------------------------------
def decoder_ar_scan(params, cfg, ling, style, framelen, clen, sample_key):
    p = params["dec_fst"]
    heads = cfg.fst_heads
    hid = cfg.ling_hiddens
    B = ling.shape[0]
    Lbuf = clen + 1
    nblk = len(p["blocks"])

    # loop-invariant conditioning & cross-attention K/V (hoisted)
    null = jnp.zeros((1, cfg.embeds), jnp.float32)
    step_cond = (linear(null, p["proj_embed"]) + p["step_bias"][0][None])[None]   # [1,1,hid]
    style_cond = linear(jnp.mean(style, axis=1), p["proj_style"])[:, None]        # [B,1,hid]
    cross_kv = decoder_cross_kv(p, ling)                                          # [B,S,2*hid] each

    kcache0 = jnp.zeros((nblk, B, Lbuf, hid), jnp.float32)
    vcache0 = jnp.zeros((nblk, B, Lbuf, hid), jnp.float32)
    x0 = jnp.broadcast_to(params["start"][None, None], (B, 1, cfg.contexts)).astype(jnp.float32)

    def step(carry, t):
        x_t, kc, vc = carry                              # x_t: [B,1,contexts]
        h = linear(x_t, p["proj_in"]) + step_cond + style_cond
        klen_self = jnp.full((B,), t + 1, jnp.int32)
        for bi, (blk, ckv) in enumerate(zip(p["blocks"], cross_kv)):
            hn = layer_norm(h, blk["ln1"])
            qkv = linear(hn, blk["self_attn"]["wqkv"])   # [B,1,3*hid]
            q = qkv[..., :hid]
            k_new = qkv[..., hid:2 * hid]
            v_new = qkv[..., 2 * hid:]
            kc = jax.lax.dynamic_update_slice(kc, k_new[None], (bi, 0, t, 0))
            vc = jax.lax.dynamic_update_slice(vc, v_new[None], (bi, 0, t, 0))
            att = attention(q, kc[bi], vc[bi], klen_self, heads)
            h = h + linear(att, blk["self_attn"]["wo"])
            hn = layer_norm(h, blk["ln2"])
            h = h + cross_mha(blk["cross_attn"], hn, ckv, framelen, heads)
            hn = layer_norm(h, blk["ln3"])
            h = h + ffn(hn, blk["ffn"])
        logits = linear(layer_norm(h, p["ln_out"]), p["proj_out"])[:, 0]          # [B, encodecs]
        code = jax.random.categorical(jax.random.fold_in(sample_key, t), logits)  # [B]
        emb = embed_code(params, params["codebooks"][0], code[:, None])[:, 0]     # [B, contexts]
        return (emb[:, None], kc, vc), (code, emb)

    _, (codes, embs) = jax.lax.scan(step, (x0, kcache0, vcache0), jnp.arange(clen))
    code_fst = codes.T                                   # [B, clen]
    cumul = jnp.transpose(embs, (1, 0, 2))               # [B, clen, contexts]
    return code_fst, cumul


# ----------------------------------------------------------------------------
# Retriever.forward
# ----------------------------------------------------------------------------
def retriever_forward(params, audio, sample_key, cfg, audlen=None, refstyle=None):
    B, T = audio.shape
    if audlen is None:
        audlen = jnp.full((B,), T, jnp.int32)

    spk, ling_feat, framelen, mask = wav2vec2_synth(params["w2v2"], cfg, audio, audlen)
    ling = linguistic_encoder(params["ling"], cfg, ling_feat, framelen, mask)
    style = retriever_ca(params["ret"], cfg, spk, framelen)

    clen = math.ceil(T / cfg.ENCODEC_STRIDES)            # static (== codelen.amax())
    codelen = jnp.ceil(audlen / cfg.ENCODEC_STRIDES).astype(jnp.int32)
    mask_c = (jnp.arange(clen)[None] < codelen[:, None]).astype(jnp.float32)
    refstyle = style if refstyle is None else refstyle

    # --- autoregressive first-quantizer pass: incremental KV-cache decode ---
    code_fst, cumul = decoder_ar_scan(params, cfg, ling, style, framelen, clen, sample_key)

    # --- non-autoregressive refinement passes (loop-invariants hoisted) ---
    codes_all = [code_fst]
    cumul = cumul * mask_c[..., None]                    # [B, clen, contexts]
    embeds = steps_mlp(params["steps"], cfg)             # [timesteps-1, embeds]
    p_rst = params["dec_rst"]
    cross_kv_rst = decoder_cross_kv(p_rst, ling)
    style_cond_rst = linear(jnp.mean(refstyle, axis=1), p_rst["proj_style"])[:, None]
    for i in range(cfg.timesteps - 1):
        step_cond = (linear(embeds[i:i + 1], p_rst["proj_embed"])
                     + p_rst["step_bias"][i][None])[None]                 # [1,1,hid]
        logits = decoder_full(p_rst, cfg.rst_heads, cumul, cross_kv_rst,
                              style_cond_rst, step_cond, codelen, framelen)
        code = jnp.argmax(logits, axis=-1)                                # [B, clen]
        codes_all.append(code)
        cumul = cumul + embed_code(params, params["codebooks"][i + 1], code) * mask_c[..., None]

    codes = jnp.stack(codes_all, axis=1) * mask_c[:, None].astype(jnp.int32)  # [B, timesteps, clen]
    wav = encodec_decode_synth(params, cfg, codes)                            # [B, clen*strides]
    wav = wav[:, :T]
    amask = (jnp.arange(T)[None] < audlen[:, None]).astype(wav.dtype)
    return wav * amask, style


# ----------------------------------------------------------------------------
# Deterministic parameter initialization
# ----------------------------------------------------------------------------
class KeyGen:
    def __init__(self, key):
        self._key = key

    def __call__(self):
        self._key, sub = jax.random.split(self._key)
        return sub


def dense_params(kg, in_dim, out_dim):
    scale = 1.0 / math.sqrt(in_dim)
    return {"w": jax.random.normal(kg(), (in_dim, out_dim), jnp.float32) * scale,
            "b": jnp.zeros((out_dim,), jnp.float32)}


def ln_params(dim):
    return {"g": jnp.ones((dim,), jnp.float32), "b": jnp.zeros((dim,), jnp.float32)}


def mha_self_params(kg, d, heads):
    # fused QKV; the 1/sqrt(dh) scale is folded into the q-part of the weights.
    s = 1.0 / math.sqrt(d // heads)
    wq, wk, wv = dense_params(kg, d, d), dense_params(kg, d, d), dense_params(kg, d, d)
    wqkv = {"w": jnp.concatenate([wq["w"] * s, wk["w"], wv["w"]], axis=1),
            "b": jnp.concatenate([wq["b"] * s, wk["b"], wv["b"]])}
    return {"wqkv": wqkv, "wo": dense_params(kg, d, d)}


def mha_cross_params(kg, dq, dkv, heads):
    s = 1.0 / math.sqrt(dq // heads)
    wq = dense_params(kg, dq, dq)
    wk, wv = dense_params(kg, dkv, dq), dense_params(kg, dkv, dq)
    return {"wq": {"w": wq["w"] * s, "b": wq["b"] * s},
            "wkv": {"w": jnp.concatenate([wk["w"], wv["w"]], axis=1),
                    "b": jnp.concatenate([wk["b"], wv["b"]])},
            "wo": dense_params(kg, dq, dq)}


def ffn_params(kg, d, f):
    a, b = dense_params(kg, d, f), dense_params(kg, f, d)
    return {"w1": a["w"], "b1": a["b"], "w2": b["w"], "b2": b["b"]}


def decoder_params(kg, cfg, heads, ffn_dim, blocks, num_timesteps):
    hid = cfg.ling_hiddens
    return {
        "proj_in": dense_params(kg, cfg.contexts, hid),
        "proj_embed": dense_params(kg, cfg.embeds, hid),
        "proj_style": dense_params(kg, cfg.styles, hid),
        "step_bias": jax.random.normal(kg(), (num_timesteps, hid), jnp.float32) * 0.02,
        "blocks": [{
            "ln1": ln_params(hid), "self_attn": mha_self_params(kg, hid, heads),
            "ln2": ln_params(hid), "cross_attn": mha_cross_params(kg, hid, hid, heads),
            "ln3": ln_params(hid), "ffn": ffn_params(kg, hid, ffn_dim),
        } for _ in range(blocks)],
        "ln_out": ln_params(hid),
        "proj_out": dense_params(kg, hid, cfg.encodecs),
    }


def init_params(cfg, kg):
    return {
        "w2v2": {
            "feat": dense_params(kg, cfg.W2V2_STRIDE, cfg.w2v2_channels),
            "spk_ling": dense_params(kg, cfg.w2v2_channels, 2 * cfg.w2v2_channels),
        },
        "ling": {
            "proj": dense_params(kg, cfg.w2v2_channels, cfg.ling_hiddens),
            "blocks": [{
                "ln1": ln_params(cfg.ling_hiddens),
                "attn": mha_self_params(kg, cfg.ling_hiddens, cfg.ling_heads),
                "ln2": ln_params(cfg.ling_hiddens),
                "ffn": ffn_params(kg, cfg.ling_hiddens, cfg.ling_ffn),
            } for _ in range(cfg.ling_blocks)],
        },
        "ret": {
            "prototypes": jax.random.normal(kg(), (cfg.prototypes, cfg.styles), jnp.float32) * 0.1,
            "blocks": [{
                "ln1": ln_params(cfg.styles),
                "attn": mha_cross_params(kg, cfg.styles, cfg.w2v2_channels, cfg.ret_heads),
                "ln2": ln_params(cfg.styles),
                "ffn": ffn_params(kg, cfg.styles, cfg.ret_ffn),
            } for _ in range(cfg.ret_blocks)],
        },
        "start": jax.random.normal(kg(), (cfg.contexts,), jnp.float32),
        "dec_fst": decoder_params(kg, cfg, cfg.fst_heads, cfg.fst_ffn, cfg.fst_blocks, 1),
        "dec_rst": decoder_params(kg, cfg, cfg.rst_heads, cfg.rst_ffn, cfg.rst_blocks,
                                  cfg.timesteps - 1),
        "steps": {"l1": dense_params(kg, cfg.pe, cfg.embeds),
                  "l2": dense_params(kg, cfg.embeds, cfg.embeds)},
        "proj_code": dense_params(kg, cfg.ENCODEC_DIM, cfg.contexts),
        "codebooks": [jax.random.normal(kg(), (cfg.encodecs, cfg.ENCODEC_DIM), jnp.float32)
                      for _ in range(cfg.timesteps)],
        "enc_dec": dense_params(kg, cfg.ENCODEC_DIM, cfg.ENCODEC_STRIDES),
    }


# ----------------------------------------------------------------------------
if __name__ == "__main__":
    cfg = Config()
    root = jax.random.PRNGKey(0)
    k_audio, k_params, k_sample = jax.random.split(root, 3)

    params = init_params(cfg, KeyGen(k_params))

    B, T = 2, 16                                  # T must be a multiple of ENCODEC_STRIDES
    audio = jax.random.uniform(k_audio, (B, T), jnp.float32, -1.0, 1.0)

    fwd = jax.jit(partial(retriever_forward, cfg=cfg))
    wav, style = fwd(params, audio, k_sample)
    jax.block_until_ready((wav, style))

    assert wav.shape == (B, T), wav.shape
    assert style.shape == (B, cfg.prototypes, cfg.styles), style.shape
    print("KERNEL_OK")
</pallas_src>

<mosaic_0001>
module attributes {stable_mosaic.version = 11 : i64} {
  func.func @_linear_kernel(%arg0: memref<8x4xf32, #tpu.memory_space<vmem>>, %arg1: memref<4x32xf32, #tpu.memory_space<vmem>>, %arg2: memref<1x32xf32, #tpu.memory_space<vmem>>, %arg3: memref<8x32xf32, #tpu.memory_space<vmem>>) attributes {dimension_semantics = [], scalar_prefetch = 0 : i64, scratch_operands = 0 : i64, tpu.core_type = #tpu.core_type<tc>} {
    %c0 = arith.constant 0 : index
    %c0_0 = arith.constant 0 : index
    %0 = vector.load %arg0[%c0, %c0_0] : memref<8x4xf32, #tpu.memory_space<vmem>>, vector<8x4xf32>
    %1 = arith.truncf %0 : vector<8x4xf32> to vector<8x4xbf16>
    %c0_1 = arith.constant 0 : index
    %c0_2 = arith.constant 0 : index
    %2 = vector.load %arg1[%c0_1, %c0_2] : memref<4x32xf32, #tpu.memory_space<vmem>>, vector<4x32xf32>
    %3 = arith.truncf %2 : vector<4x32xf32> to vector<4x32xbf16>
    %cst = arith.constant dense<0.000000e+00> : vector<8x32xf32>
    %4 = tpu.matmul %1, %3, %cst {dimension_numbers = #tpu.dot_dimension_numbers<[1], [0], [0], [1], [0, 0, 1, 1], [], []>} : vector<8x4xbf16>, vector<4x32xbf16>, vector<8x32xf32> -> vector<8x32xf32>
    %c0_3 = arith.constant 0 : index
    %c0_4 = arith.constant 0 : index
    %5 = vector.load %arg2[%c0_3, %c0_4] : memref<1x32xf32, #tpu.memory_space<vmem>>, vector<1x32xf32>
    %6 = vector.broadcast %5 : vector<1x32xf32> to vector<8x32xf32>
    %7 = arith.addf %4, %6 : vector<8x32xf32>
    %c0_5 = arith.constant 0 : index
    %c0_6 = arith.constant 0 : index
    %8 = vector.load %arg3[%c0_5, %c0_6] : memref<8x32xf32, #tpu.memory_space<vmem>>, vector<8x32xf32>
    tpu.vector_store %arg3[%c0_5, %c0_6], %7 {strides = array<i32>} : memref<8x32xf32, #tpu.memory_space<vmem>>, vector<8x32xf32>,
    return
  }
}

module attributes {stable_mosaic.version = 11 : i64} {
  func.func @_linear_kernel(%arg0: memref<8x32xf32, #tpu.memory_space<vmem>>, %arg1: memref<32x64xf32, #tpu.memory_space<vmem>>, %arg2: memref<1x64xf32, #tpu.memory_space<vmem>>, %arg3: memref<8x64xf32, #tpu.memory_space<vmem>>) attributes {dimension_semantics = [], scalar_prefetch = 0 : i64, scratch_operands = 0 : i64, tpu.core_type = #tpu.core_type<tc>} {
    %c0 = arith.constant 0 : index
    %c0_0 = arith.constant 0 : index
    %0 = vector.load %arg0[%c0, %c0_0] : memref<8x32xf32, #tpu.memory_space<vmem>>, vector<8x32xf32>
    %1 = arith.truncf %0 : vector<8x32xf32> to vector<8x32xbf16>
    %c0_1 = arith.constant 0 : index
    %c0_2 = arith.constant 0 : index
    %2 = vector.load %arg1[%c0_1, %c0_2] : memref<32x64xf32, #tpu.memory_space<vmem>>, vector<32x64xf32>
    %3 = arith.truncf %2 : vector<32x64xf32> to vector<32x64xbf16>
    %cst = arith.constant dense<0.000000e+00> : vector<8x64xf32>
    %4 = tpu.matmul %1, %3, %cst {dimension_numbers = #tpu.dot_dimension_numbers<[1], [0], [0], [1], [0, 0, 1, 1], [], []>} : vector<8x32xbf16>, vector<32x64xbf16>, vector<8x64xf32> -> vector<8x64xf32>
    %c0_3 = arith.constant 0 : index
    %c0_4 = arith.constant 0 : index
    %5 = vector.load %arg2[%c0_3, %c0_4] : memref<1x64xf32, #tpu.memory_space<vmem>>, vector<1x64xf32>
    %6 = vector.broadcast %5 : vector<1x64xf32> to vector<8x64xf32>
    %7 = arith.addf %4, %6 : vector<8x64xf32>
    %c0_5 = arith.constant 0 : index
    %c0_6 = arith.constant 0 : index
    %8 = vector.load %arg3[%c0_5, %c0_6] : memref<8x64xf32, #tpu.memory_space<vmem>>, vector<8x64xf32>
    tpu.vector_store %arg3[%c0_5, %c0_6], %7 {strides = array<i32>} : memref<8x64xf32, #tpu.memory_space<vmem>>, vector<8x64xf32>,
    return
  }
}

module attributes {stable_mosaic.version = 11 : i64} {
  func.func @_linear_kernel(%arg0: memref<8x32xf32, #tpu.memory_space<vmem>>, %arg1: memref<32x32xf32, #tpu.memory_space<vmem>>, %arg2: memref<1x32xf32, #tpu.memory_space<vmem>>, %arg3: memref<8x32xf32, #tpu.memory_space<vmem>>) attributes {dimension_semantics = [], scalar_prefetch = 0 : i64, scratch_operands = 0 : i64, tpu.core_type = #tpu.core_type<tc>} {
    %c0 = arith.constant 0 : index
    %c0_0 = arith.constant 0 : index
    %0 = vector.load %arg0[%c0, %c0_0] : memref<8x32xf32, #tpu.memory_space<vmem>>, vector<8x32xf32>
    %1 = arith.truncf %0 : vector<8x32xf32> to vector<8x32xbf16>
    %c0_1 = arith.constant 0 : index
    %c0_2 = arith.constant 0 : index
    %2 = vector.load %arg1[%c0_1, %c0_2] : memref<32x32xf32, #tpu.memory_space<vmem>>, vector<32x32xf32>
    %3 = arith.truncf %2 : vector<32x32xf32> to vector<32x32xbf16>
    %cst = arith.constant dense<0.000000e+00> : vector<8x32xf32>
    %4 = tpu.matmul %1, %3, %cst {dimension_numbers = #tpu.dot_dimension_numbers<[1], [0], [0], [1], [0, 0, 1, 1], [], []>} : vector<8x32xbf16>, vector<32x32xbf16>, vector<8x32xf32> -> vector<8x32xf32>
    %c0_3 = arith.constant 0 : index
    %c0_4 = arith.constant 0 : index
    %5 = vector.load %arg2[%c0_3, %c0_4] : memref<1x32xf32, #tpu.memory_space<vmem>>, vector<1x32xf32>
    %6 = vector.broadcast %5 : vector<1x32xf32> to vector<8x32xf32>
    %7 = arith.addf %4, %6 : vector<8x32xf32>
    %c0_5 = arith.constant 0 : index
    %c0_6 = arith.constant 0 : index
    %8 = vector.load %arg3[%c0_5, %c0_6] : memref<8x32xf32, #tpu.memory_space<vmem>>, vector<8x32xf32>
    tpu.vector_store %arg3[%c0_5, %c0_6], %7 {strides = array<i32>} : memref<8x32xf32, #tpu.memory_space<vmem>>, vector<8x32xf32>,
    return
  }
}

module attributes {stable_mosaic.version = 11 : i64} {
  func.func @_attn_kernel(%arg0: i32, %arg1: memref<2xi32, #tpu.memory_space<smem>>, %arg2: memref<1x4x32xf32, #tpu.memory_space<vmem>>, %arg3: memref<1x4x32xf32, #tpu.memory_space<vmem>>, %arg4: memref<1x4x32xf32, #tpu.memory_space<vmem>>, %arg5: memref<1x4x32xf32, #tpu.memory_space<vmem>>) attributes {dimension_semantics = [#tpu.dimension_semantics<parallel>], iteration_bounds = array<i64: 2>, scalar_prefetch = 1 : i64, scratch_operands = 0 : i64, tpu.core_type = #tpu.core_type<tc>, window_params = [{transform_indices = @transform_0, window_bounds = array<i64: 1, 4, 32>}, {transform_indices = @transform_1, window_bounds = array<i64: 1, 4, 32>}, {transform_indices = @transform_2, window_bounds = array<i64: 1, 4, 32>}, {transform_indices = @transform_3, window_bounds = array<i64: 1, 4, 32>}]} {
    %0 = arith.index_cast %arg0 : i32 to index
    %1 = memref.load %arg1[%0] : memref<2xi32, #tpu.memory_space<smem>>
    %2 = tpu.iota {dimensions = array<i32: 1>} : vector<1x4xi32>
    %3 = vector.broadcast %1 : i32 to vector<1x4xi32>
    %4 = arith.cmpi slt, %2, %3 : vector<1x4xi32>
    %cst = arith.constant 0.000000e+00 : f32
    %cst_0 = arith.constant -1.000000e+09 : f32
    %5 = vector.broadcast %cst : f32 to vector<1x4xf32>
    %6 = vector.broadcast %cst_0 : f32 to vector<1x4xf32>
    %7 = arith.select %4, %5, %6 : vector<1x4xi1>, vector<1x4xf32>
    %c0 = arith.constant 0 : index
    %c0_1 = arith.constant 0 : index
    %c0_2 = arith.constant 0 : index
    %8 = vector.load %arg2[%c0, %c0_1, %c0_2] : memref<1x4x32xf32, #tpu.memory_space<vmem>>, vector<1x4x32xf32>
    %9 = vector.shape_cast %8 : vector<1x4x32xf32> to vector<4x32xf32>
    %c0_3 = arith.constant 0 : index
    %c0_4 = arith.constant 0 : index
    %c0_5 = arith.constant 0 : index
    %10 = vector.load %arg3[%c0_3, %c0_4, %c0_5] : memref<1x4x32xf32, #tpu.memory_space<vmem>>, vector<1x4x32xf32>
    %11 = vector.shape_cast %10 : vector<1x4x32xf32> to vector<4x32xf32>
    %c0_6 = arith.constant 0 : index
    %c0_7 = arith.constant 0 : index
    %c0_8 = arith.constant 0 : index
    %12 = vector.load %arg4[%c0_6, %c0_7, %c0_8] : memref<1x4x32xf32, #tpu.memory_space<vmem>>, vector<1x4x32xf32>
    %13 = vector.shape_cast %12 : vector<1x4x32xf32> to vector<4x32xf32>
    %14 = vector.extract_strided_slice %9 {offsets = [0, 0], sizes = [4, 16], strides = [1, 1]} : vector<4x32xf32> to vector<4x16xf32>
    %15 = arith.truncf %14 : vector<4x16xf32> to vector<4x16xbf16>
    %16 = vector.extract_strided_slice %11 {offsets = [0, 0], sizes = [4, 16], strides = [1, 1]} : vector<4x32xf32> to vector<4x16xf32>
    %17 = arith.truncf %16 : vector<4x16xf32> to vector<4x16xbf16>
    %18 = vector.extract_strided_slice %13 {offsets = [0, 0], sizes = [4, 16], strides = [1, 1]} : vector<4x32xf32> to vector<4x16xf32>
    %19 = arith.truncf %18 : vector<4x16xf32> to vector<4x16xbf16>
    %cst_9 = arith.constant dense<0.000000e+00> : vector<4x4xf32>
    %20 = tpu.matmul %15, %17, %cst_9 {dimension_numbers = #tpu.dot_dimension_numbers<[1], [1], [0], [0], [0, 0, 1, 0], [], []>} : vector<4x16xbf16>, vector<4x16xbf16>, vector<4x4xf32> -> vector<4x4xf32>
    %21 = vector.broadcast %7 : vector<1x4xf32> to vector<4x4xf32>
    %22 = arith.addf %20, %21 : vector<4x4xf32>
    %cst_10 = arith.constant dense<0xFF800000> : vector<4xf32>
    %23 = vector.multi_reduction <maximumf>, %22, %cst_10 [1] : vector<4x4xf32> to vector<4xf32>
    %24 = vector.shape_cast %23 : vector<4xf32> to vector<4x1xf32>
    %25 = vector.broadcast %24 : vector<4x1xf32> to vector<4x4xf32>
    %26 = arith.subf %22, %25 : vector<4x4xf32>
    %27 = math.exp %26 : vector<4x4xf32>
    %cst_11 = arith.constant dense<0.000000e+00> : vector<4xf32>
    %28 = vector.multi_reduction <add>, %27, %cst_11 [1] : vector<4x4xf32> to vector<4xf32>
    %29 = vector.shape_cast %28 : vector<4xf32> to vector<4x1xf32>
    %30 = tpu.reciprocal %29 {approx = true} : vector<4x1xf32> -> vector<4x1xf32>
    %31 = vector.broadcast %30 : vector<4x1xf32> to vector<4x4xf32>
    %32 = arith.mulf %27, %31 : vector<4x4xf32>
    %33 = arith.truncf %32 : vector<4x4xf32> to vector<4x4xbf16>
    %cst_12 = arith.constant dense<0.000000e+00> : vector<4x16xf32>
    %34 = tpu.matmul %33, %19, %cst_12 {dimension_numbers = #tpu.dot_dimension_numbers<[1], [0], [0], [1], [0, 0, 1, 1], [], []>} : vector<4x4xbf16>, vector<4x16xbf16>, vector<4x16xf32> -> vector<4x16xf32>
    %35 = vector.extract_strided_slice %9 {offsets = [0, 16], sizes = [4, 16], strides = [1, 1]} : vector<4x32xf32> to vector<4x16xf32>
    %36 = arith.truncf %35 : vector<4x16xf32> to vector<4x16xbf16>
    %37 = vector.extract_strided_slice %11 {offsets = [0, 16], sizes = [4, 16], strides = [1, 1]} : vector<4x32xf32> to vector<4x16xf32>
    %38 = arith.truncf %37 : vector<4x16xf32> to vector<4x16xbf16>
    %39 = vector.extract_strided_slice %13 {offsets = [0, 16], sizes = [4, 16], strides = [1, 1]} : vector<4x32xf32> to vector<4x16xf32>
    %40 = arith.truncf %39 : vector<4x16xf32> to vector<4x16xbf16>
    %cst_13 = arith.constant dense<0.000000e+00> : vector<4x4xf32>
    %41 = tpu.matmul %36, %38, %cst_13 {dimension_numbers = #tpu.dot_dimension_numbers<[1], [1], [0], [0], [0, 0, 1, 0], [], []>} : vector<4x16xbf16>, vector<4x16xbf16>, vector<4x4xf32> -> vector<4x4xf32>
    %42 = vector.broadcast %7 : vector<1x4xf32> to vector<4x4xf32>
    %43 = arith.addf %41, %42 : vector<4x4xf32>
    %cst_14 = arith.constant dense<0xFF800000> : vector<4xf32>
    %44 = vector.multi_reduction <maximumf>, %43, %cst_14 [1] : vector<4x4xf32> to vector<4xf32>
    %45 = vector.shape_cast %44 : vector<4xf32> to vector<4x1xf32>
    %46 = vector.broadcast %45 : vector<4x1xf32> to vector<4x4xf32>
    %47 = arith.subf %43, %46 : vector<4x4xf32>
    %48 = math.exp %47 : vector<4x4xf32>
    %cst_15 = arith.constant dense<0.000000e+00> : vector<4xf32>
    %49 = vector.multi_reduction <add>, %48, %cst_15 [1] : vector<4x4xf32> to vector<4xf32>
    %50 = vector.shape_cast %49 : vector<4xf32> to vector<4x1xf32>
    %51 = tpu.reciprocal %50 {approx = true} : vector<4x1xf32> -> vector<4x1xf32>
    %52 = vector.broadcast %51 : vector<4x1xf32> to vector<4x4xf32>
    %53 = arith.mulf %48, %52 : vector<4x4xf32>
    %54 = arith.truncf %53 : vector<4x4xf32> to vector<4x4xbf16>
    %cst_16 = arith.constant dense<0.000000e+00> : vector<4x16xf32>
    %55 = tpu.matmul %54, %40, %cst_16 {dimension_numbers = #tpu.dot_dimension_numbers<[1], [0], [0], [1], [0, 0, 1, 1], [], []>} : vector<4x4xbf16>, vector<4x16xbf16>, vector<4x16xf32> -> vector<4x16xf32>
    %56 = tpu.concatenate %34, %55 in 1 : vector<4x16xf32>, vector<4x16xf32> -> vector<4x32xf32>
    %c0_17 = arith.constant 0 : index
    %c0_18 = arith.constant 0 : index
    %c0_19 = arith.constant 0 : index
    %57 = vector.load %arg5[%c0_17, %c0_18, %c0_19] : memref<1x4x32xf32, #tpu.memory_space<vmem>>, vector<1x4x32xf32>
    %58 = vector.shape_cast %57 : vector<1x4x32xf32> to vector<4x32xf32>
    %59 = vector.shape_cast %56 : vector<4x32xf32> to vector<1x4x32xf32>
    tpu.vector_store %arg5[%c0_17, %c0_18, %c0_19], %59 {strides = array<i32>} : memref<1x4x32xf32, #tpu.memory_space<vmem>>, vector<1x4x32xf32>,
    return
  }
  func.func @transform_0(%arg0: i32, %arg1: memref<2xi32, #tpu.memory_space<smem>>) -> (i32, i32, i32) {
    %c0_i32 = arith.constant 0 : i32
    %c0_i32_0 = arith.constant 0 : i32
    %c0_i32_1 = arith.constant 0 : i32
    return %arg0, %c0_i32, %c0_i32_0 : i32, i32, i32
  }
  func.func @transform_1(%arg0: i32, %arg1: memref<2xi32, #tpu.memory_space<smem>>) -> (i32, i32, i32) {
    %c0_i32 = arith.constant 0 : i32
    %c0_i32_0 = arith.constant 0 : i32
    %c0_i32_1 = arith.constant 0 : i32
    return %arg0, %c0_i32, %c0_i32_0 : i32, i32, i32
  }
  func.func @transform_2(%arg0: i32, %arg1: memref<2xi32, #tpu.memory_space<smem>>) -> (i32, i32, i32) {
    %c0_i32 = arith.constant 0 : i32
    %c0_i32_0 = arith.constant 0 : i32
    %c0_i32_1 = arith.constant 0 : i32
    return %arg0, %c0_i32, %c0_i32_0 : i32, i32, i32
  }
  func.func @transform_3(%arg0: i32, %arg1: memref<2xi32, #tpu.memory_space<smem>>) -> (i32, i32, i32) {
    %c0_i32 = arith.constant 0 : i32
    %c0_i32_0 = arith.constant 0 : i32
    %c0_i32_1 = arith.constant 0 : i32
    return %arg0, %c0_i32, %c0_i32_0 : i32, i32, i32
  }
}

module attributes {stable_mosaic.version = 11 : i64} {
  func.func @_linear_kernel(%arg0: memref<8x32xf32, #tpu.memory_space<vmem>>, %arg1: memref<32x96xf32, #tpu.memory_space<vmem>>, %arg2: memref<1x96xf32, #tpu.memory_space<vmem>>, %arg3: memref<8x96xf32, #tpu.memory_space<vmem>>) attributes {dimension_semantics = [], scalar_prefetch = 0 : i64, scratch_operands = 0 : i64, tpu.core_type = #tpu.core_type<tc>} {
    %c0 = arith.constant 0 : index
    %c0_0 = arith.constant 0 : index
    %0 = vector.load %arg0[%c0, %c0_0] : memref<8x32xf32, #tpu.memory_space<vmem>>, vector<8x32xf32>
    %1 = arith.truncf %0 : vector<8x32xf32> to vector<8x32xbf16>
    %c0_1 = arith.constant 0 : index
    %c0_2 = arith.constant 0 : index
    %2 = vector.load %arg1[%c0_1, %c0_2] : memref<32x96xf32, #tpu.memory_space<vmem>>, vector<32x96xf32>
    %3 = arith.truncf %2 : vector<32x96xf32> to vector<32x96xbf16>
    %cst = arith.constant dense<0.000000e+00> : vector<8x96xf32>
    %4 = tpu.matmul %1, %3, %cst {dimension_numbers = #tpu.dot_dimension_numbers<[1], [0], [0], [1], [0, 0, 1, 1], [], []>} : vector<8x32xbf16>, vector<32x96xbf16>, vector<8x96xf32> -> vector<8x96xf32>
    %c0_3 = arith.constant 0 : index
    %c0_4 = arith.constant 0 : index
    %5 = vector.load %arg2[%c0_3, %c0_4] : memref<1x96xf32, #tpu.memory_space<vmem>>, vector<1x96xf32>
    %6 = vector.broadcast %5 : vector<1x96xf32> to vector<8x96xf32>
    %7 = arith.addf %4, %6 : vector<8x96xf32>
    %c0_5 = arith.constant 0 : index
    %c0_6 = arith.constant 0 : index
    %8 = vector.load %arg3[%c0_5, %c0_6] : memref<8x96xf32, #tpu.memory_space<vmem>>, vector<8x96xf32>
    tpu.vector_store %arg3[%c0_5, %c0_6], %7 {strides = array<i32>} : memref<8x96xf32, #tpu.memory_space<vmem>>, vector<8x96xf32>,
    return
  }
}

module attributes {stable_mosaic.version = 11 : i64} {
  func.func @_ffn_kernel(%arg0: memref<8x32xf32, #tpu.memory_space<vmem>>, %arg1: memref<32x64xf32, #tpu.memory_space<vmem>>, %arg2: memref<1x64xf32, #tpu.memory_space<vmem>>, %arg3: memref<64x32xf32, #tpu.memory_space<vmem>>, %arg4: memref<1x32xf32, #tpu.memory_space<vmem>>, %arg5: memref<8x32xf32, #tpu.memory_space<vmem>>) attributes {dimension_semantics = [], scalar_prefetch = 0 : i64, scratch_operands = 0 : i64, tpu.core_type = #tpu.core_type<tc>} {
    %c0 = arith.constant 0 : index
    %c0_0 = arith.constant 0 : index
    %0 = vector.load %arg0[%c0, %c0_0] : memref<8x32xf32, #tpu.memory_space<vmem>>, vector<8x32xf32>
    %1 = arith.truncf %0 : vector<8x32xf32> to vector<8x32xbf16>
    %c0_1 = arith.constant 0 : index
    %c0_2 = arith.constant 0 : index
    %2 = vector.load %arg1[%c0_1, %c0_2] : memref<32x64xf32, #tpu.memory_space<vmem>>, vector<32x64xf32>
    %3 = arith.truncf %2 : vector<32x64xf32> to vector<32x64xbf16>
    %cst = arith.constant dense<0.000000e+00> : vector<8x64xf32>
    %4 = tpu.matmul %1, %3, %cst {dimension_numbers = #tpu.dot_dimension_numbers<[1], [0], [0], [1], [0, 0, 1, 1], [], []>} : vector<8x32xbf16>, vector<32x64xbf16>, vector<8x64xf32> -> vector<8x64xf32>
    %c0_3 = arith.constant 0 : index
    %c0_4 = arith.constant 0 : index
    %5 = vector.load %arg2[%c0_3, %c0_4] : memref<1x64xf32, #tpu.memory_space<vmem>>, vector<1x64xf32>
    %6 = vector.broadcast %5 : vector<1x64xf32> to vector<8x64xf32>
    %7 = arith.addf %4, %6 : vector<8x64xf32>
    %cst_5 = arith.constant 0.000000e+00 : f32
    %8 = vector.broadcast %cst_5 : f32 to vector<8x64xf32>
    %9 = arith.maximumf %7, %8 : vector<8x64xf32>
    %10 = arith.truncf %9 : vector<8x64xf32> to vector<8x64xbf16>
    %c0_6 = arith.constant 0 : index
    %c0_7 = arith.constant 0 : index
    %11 = vector.load %arg3[%c0_6, %c0_7] : memref<64x32xf32, #tpu.memory_space<vmem>>, vector<64x32xf32>
    %12 = arith.truncf %11 : vector<64x32xf32> to vector<64x32xbf16>
    %cst_8 = arith.constant dense<0.000000e+00> : vector<8x32xf32>
    %13 = tpu.matmul %10, %12, %cst_8 {dimension_numbers = #tpu.dot_dimension_numbers<[1], [0], [0], [1], [0, 0, 1, 1], [], []>} : vector<8x64xbf16>, vector<64x32xbf16>, vector<8x32xf32> -> vector<8x32xf32>
    %c0_9 = arith.constant 0 : index
    %c0_10 = arith.constant 0 : index
    %14 = vector.load %arg4[%c0_9, %c0_10] : memref<1x32xf32, #tpu.memory_space<vmem>>, vector<1x32xf32>
    %15 = vector.broadcast %14 : vector<1x32xf32> to vector<8x32xf32>
    %16 = arith.addf %13, %15 : vector<8x32xf32>
    %c0_11 = arith.constant 0 : index
    %c0_12 = arith.constant 0 : index
    %17 = vector.load %arg5[%c0_11, %c0_12] : memref<8x32xf32, #tpu.memory_space<vmem>>, vector<8x32xf32>
    tpu.vector_store %arg5[%c0_11, %c0_12], %16 {strides = array<i32>} : memref<8x32xf32, #tpu.memory_space<vmem>>, vector<8x32xf32>,
    return
  }
}

module attributes {stable_mosaic.version = 11 : i64} {
  func.func @_attn_kernel(%arg0: i32, %arg1: memref<2xi32, #tpu.memory_space<smem>>, %arg2: memref<1x4x16xf32, #tpu.memory_space<vmem>>, %arg3: memref<1x4x16xf32, #tpu.memory_space<vmem>>, %arg4: memref<1x4x16xf32, #tpu.memory_space<vmem>>, %arg5: memref<1x4x16xf32, #tpu.memory_space<vmem>>) attributes {dimension_semantics = [#tpu.dimension_semantics<parallel>], iteration_bounds = array<i64: 2>, scalar_prefetch = 1 : i64, scratch_operands = 0 : i64, tpu.core_type = #tpu.core_type<tc>, window_params = [{transform_indices = @transform_0, window_bounds = array<i64: 1, 4, 16>}, {transform_indices = @transform_1, window_bounds = array<i64: 1, 4, 16>}, {transform_indices = @transform_2, window_bounds = array<i64: 1, 4, 16>}, {transform_indices = @transform_3, window_bounds = array<i64: 1, 4, 16>}]} {
    %0 = arith.index_cast %arg0 : i32 to index
    %1 = memref.load %arg1[%0] : memref<2xi32, #tpu.memory_space<smem>>
    %2 = tpu.iota {dimensions = array<i32: 1>} : vector<1x4xi32>
    %3 = vector.broadcast %1 : i32 to vector<1x4xi32>
    %4 = arith.cmpi slt, %2, %3 : vector<1x4xi32>
    %cst = arith.constant 0.000000e+00 : f32
    %cst_0 = arith.constant -1.000000e+09 : f32
    %5 = vector.broadcast %cst : f32 to vector<1x4xf32>
    %6 = vector.broadcast %cst_0 : f32 to vector<1x4xf32>
    %7 = arith.select %4, %5, %6 : vector<1x4xi1>, vector<1x4xf32>
    %c0 = arith.constant 0 : index
    %c0_1 = arith.constant 0 : index
    %c0_2 = arith.constant 0 : index
    %8 = vector.load %arg2[%c0, %c0_1, %c0_2] : memref<1x4x16xf32, #tpu.memory_space<vmem>>, vector<1x4x16xf32>
    %9 = vector.shape_cast %8 : vector<1x4x16xf32> to vector<4x16xf32>
    %c0_3 = arith.constant 0 : index
    %c0_4 = arith.constant 0 : index
    %c0_5 = arith.constant 0 : index
    %10 = vector.load %arg3[%c0_3, %c0_4, %c0_5] : memref<1x4x16xf32, #tpu.memory_space<vmem>>, vector<1x4x16xf32>
    %11 = vector.shape_cast %10 : vector<1x4x16xf32> to vector<4x16xf32>
    %c0_6 = arith.constant 0 : index
    %c0_7 = arith.constant 0 : index
    %c0_8 = arith.constant 0 : index
    %12 = vector.load %arg4[%c0_6, %c0_7, %c0_8] : memref<1x4x16xf32, #tpu.memory_space<vmem>>, vector<1x4x16xf32>
    %13 = vector.shape_cast %12 : vector<1x4x16xf32> to vector<4x16xf32>
    %14 = vector.extract_strided_slice %9 {offsets = [0, 0], sizes = [4, 8], strides = [1, 1]} : vector<4x16xf32> to vector<4x8xf32>
    %15 = arith.truncf %14 : vector<4x8xf32> to vector<4x8xbf16>
    %16 = vector.extract_strided_slice %11 {offsets = [0, 0], sizes = [4, 8], strides = [1, 1]} : vector<4x16xf32> to vector<4x8xf32>
    %17 = arith.truncf %16 : vector<4x8xf32> to vector<4x8xbf16>
    %18 = vector.extract_strided_slice %13 {offsets = [0, 0], sizes = [4, 8], strides = [1, 1]} : vector<4x16xf32> to vector<4x8xf32>
    %19 = arith.truncf %18 : vector<4x8xf32> to vector<4x8xbf16>
    %cst_9 = arith.constant dense<0.000000e+00> : vector<4x4xf32>
    %20 = tpu.matmul %15, %17, %cst_9 {dimension_numbers = #tpu.dot_dimension_numbers<[1], [1], [0], [0], [0, 0, 1, 0], [], []>} : vector<4x8xbf16>, vector<4x8xbf16>, vector<4x4xf32> -> vector<4x4xf32>
    %21 = vector.broadcast %7 : vector<1x4xf32> to vector<4x4xf32>
    %22 = arith.addf %20, %21 : vector<4x4xf32>
    %cst_10 = arith.constant dense<0xFF800000> : vector<4xf32>
    %23 = vector.multi_reduction <maximumf>, %22, %cst_10 [1] : vector<4x4xf32> to vector<4xf32>
    %24 = vector.shape_cast %23 : vector<4xf32> to vector<4x1xf32>
    %25 = vector.broadcast %24 : vector<4x1xf32> to vector<4x4xf32>
    %26 = arith.subf %22, %25 : vector<4x4xf32>
    %27 = math.exp %26 : vector<4x4xf32>
    %cst_11 = arith.constant dense<0.000000e+00> : vector<4xf32>
    %28 = vector.multi_reduction <add>, %27, %cst_11 [1] : vector<4x4xf32> to vector<4xf32>
    %29 = vector.shape_cast %28 : vector<4xf32> to vector<4x1xf32>
    %30 = tpu.reciprocal %29 {approx = true} : vector<4x1xf32> -> vector<4x1xf32>
    %31 = vector.broadcast %30 : vector<4x1xf32> to vector<4x4xf32>
    %32 = arith.mulf %27, %31 : vector<4x4xf32>
    %33 = arith.truncf %32 : vector<4x4xf32> to vector<4x4xbf16>
    %cst_12 = arith.constant dense<0.000000e+00> : vector<4x8xf32>
    %34 = tpu.matmul %33, %19, %cst_12 {dimension_numbers = #tpu.dot_dimension_numbers<[1], [0], [0], [1], [0, 0, 1, 1], [], []>} : vector<4x4xbf16>, vector<4x8xbf16>, vector<4x8xf32> -> vector<4x8xf32>
    %35 = vector.extract_strided_slice %9 {offsets = [0, 8], sizes = [4, 8], strides = [1, 1]} : vector<4x16xf32> to vector<4x8xf32>
    %36 = arith.truncf %35 : vector<4x8xf32> to vector<4x8xbf16>
    %37 = vector.extract_strided_slice %11 {offsets = [0, 8], sizes = [4, 8], strides = [1, 1]} : vector<4x16xf32> to vector<4x8xf32>
    %38 = arith.truncf %37 : vector<4x8xf32> to vector<4x8xbf16>
    %39 = vector.extract_strided_slice %13 {offsets = [0, 8], sizes = [4, 8], strides = [1, 1]} : vector<4x16xf32> to vector<4x8xf32>
    %40 = arith.truncf %39 : vector<4x8xf32> to vector<4x8xbf16>
    %cst_13 = arith.constant dense<0.000000e+00> : vector<4x4xf32>
    %41 = tpu.matmul %36, %38, %cst_13 {dimension_numbers = #tpu.dot_dimension_numbers<[1], [1], [0], [0], [0, 0, 1, 0], [], []>} : vector<4x8xbf16>, vector<4x8xbf16>, vector<4x4xf32> -> vector<4x4xf32>
    %42 = vector.broadcast %7 : vector<1x4xf32> to vector<4x4xf32>
    %43 = arith.addf %41, %42 : vector<4x4xf32>
    %cst_14 = arith.constant dense<0xFF800000> : vector<4xf32>
    %44 = vector.multi_reduction <maximumf>, %43, %cst_14 [1] : vector<4x4xf32> to vector<4xf32>
    %45 = vector.shape_cast %44 : vector<4xf32> to vector<4x1xf32>
    %46 = vector.broadcast %45 : vector<4x1xf32> to vector<4x4xf32>
    %47 = arith.subf %43, %46 : vector<4x4xf32>
    %48 = math.exp %47 : vector<4x4xf32>
    %cst_15 = arith.constant dense<0.000000e+00> : vector<4xf32>
    %49 = vector.multi_reduction <add>, %48, %cst_15 [1] : vector<4x4xf32> to vector<4xf32>
    %50 = vector.shape_cast %49 : vector<4xf32> to vector<4x1xf32>
    %51 = tpu.reciprocal %50 {approx = true} : vector<4x1xf32> -> vector<4x1xf32>
    %52 = vector.broadcast %51 : vector<4x1xf32> to vector<4x4xf32>
    %53 = arith.mulf %48, %52 : vector<4x4xf32>
    %54 = arith.truncf %53 : vector<4x4xf32> to vector<4x4xbf16>
    %cst_16 = arith.constant dense<0.000000e+00> : vector<4x8xf32>
    %55 = tpu.matmul %54, %40, %cst_16 {dimension_numbers = #tpu.dot_dimension_numbers<[1], [0], [0], [1], [0, 0, 1, 1], [], []>} : vector<4x4xbf16>, vector<4x8xbf16>, vector<4x8xf32> -> vector<4x8xf32>
    %56 = tpu.concatenate %34, %55 in 1 : vector<4x8xf32>, vector<4x8xf32> -> vector<4x16xf32>
    %c0_17 = arith.constant 0 : index
    %c0_18 = arith.constant 0 : index
    %c0_19 = arith.constant 0 : index
    %57 = vector.load %arg5[%c0_17, %c0_18, %c0_19] : memref<1x4x16xf32, #tpu.memory_space<vmem>>, vector<1x4x16xf32>
    %58 = vector.shape_cast %57 : vector<1x4x16xf32> to vector<4x16xf32>
    %59 = vector.shape_cast %56 : vector<4x16xf32> to vector<1x4x16xf32>
    tpu.vector_store %arg5[%c0_17, %c0_18, %c0_19], %59 {strides = array<i32>} : memref<1x4x16xf32, #tpu.memory_space<vmem>>, vector<1x4x16xf32>,
    return
  }
  func.func @transform_0(%arg0: i32, %arg1: memref<2xi32, #tpu.memory_space<smem>>) -> (i32, i32, i32) {
    %c0_i32 = arith.constant 0 : i32
    %c0_i32_0 = arith.constant 0 : i32
    %c0_i32_1 = arith.constant 0 : i32
    return %arg0, %c0_i32, %c0_i32_0 : i32, i32, i32
  }
  func.func @transform_1(%arg0: i32, %arg1: memref<2xi32, #tpu.memory_space<smem>>) -> (i32, i32, i32) {
    %c0_i32 = arith.constant 0 : i32
    %c0_i32_0 = arith.constant 0 : i32
    %c0_i32_1 = arith.constant 0 : i32
    return %arg0, %c0_i32, %c0_i32_0 : i32, i32, i32
  }
  func.func @transform_2(%arg0: i32, %arg1: memref<2xi32, #tpu.memory_space<smem>>) -> (i32, i32, i32) {
    %c0_i32 = arith.constant 0 : i32
    %c0_i32_0 = arith.constant 0 : i32
    %c0_i32_1 = arith.constant 0 : i32
    return %arg0, %c0_i32, %c0_i32_0 : i32, i32, i32
  }
  func.func @transform_3(%arg0: i32, %arg1: memref<2xi32, #tpu.memory_space<smem>>) -> (i32, i32, i32) {
    %c0_i32 = arith.constant 0 : i32
    %c0_i32_0 = arith.constant 0 : i32
    %c0_i32_1 = arith.constant 0 : i32
    return %arg0, %c0_i32, %c0_i32_0 : i32, i32, i32
  }
}

module attributes {stable_mosaic.version = 11 : i64} {
  func.func @_linear_kernel(%arg0: memref<8x16xf32, #tpu.memory_space<vmem>>, %arg1: memref<16x16xf32, #tpu.memory_space<vmem>>, %arg2: memref<1x16xf32, #tpu.memory_space<vmem>>, %arg3: memref<8x16xf32, #tpu.memory_space<vmem>>) attributes {dimension_semantics = [], scalar_prefetch = 0 : i64, scratch_operands = 0 : i64, tpu.core_type = #tpu.core_type<tc>} {
    %c0 = arith.constant 0 : index
    %c0_0 = arith.constant 0 : index
    %0 = vector.load %arg0[%c0, %c0_0] : memref<8x16xf32, #tpu.memory_space<vmem>>, vector<8x16xf32>
    %1 = arith.truncf %0 : vector<8x16xf32> to vector<8x16xbf16>
    %c0_1 = arith.constant 0 : index
    %c0_2 = arith.constant 0 : index
    %2 = vector.load %arg1[%c0_1, %c0_2] : memref<16x16xf32, #tpu.memory_space<vmem>>, vector<16x16xf32>
    %3 = arith.truncf %2 : vector<16x16xf32> to vector<16x16xbf16>
    %cst = arith.constant dense<0.000000e+00> : vector<8x16xf32>
    %4 = tpu.matmul %1, %3, %cst {dimension_numbers = #tpu.dot_dimension_numbers<[1], [0], [0], [1], [0, 0, 1, 1], [], []>} : vector<8x16xbf16>, vector<16x16xbf16>, vector<8x16xf32> -> vector<8x16xf32>
    %c0_3 = arith.constant 0 : index
    %c0_4 = arith.constant 0 : index
    %5 = vector.load %arg2[%c0_3, %c0_4] : memref<1x16xf32, #tpu.memory_space<vmem>>, vector<1x16xf32>
    %6 = vector.broadcast %5 : vector<1x16xf32> to vector<8x16xf32>
    %7 = arith.addf %4, %6 : vector<8x16xf32>
    %c0_5 = arith.constant 0 : index
    %c0_6 = arith.constant 0 : index
    %8 = vector.load %arg3[%c0_5, %c0_6] : memref<8x16xf32, #tpu.memory_space<vmem>>, vector<8x16xf32>
    tpu.vector_store %arg3[%c0_5, %c0_6], %7 {strides = array<i32>} : memref<8x16xf32, #tpu.memory_space<vmem>>, vector<8x16xf32>,
    return
  }
}

module attributes {stable_mosaic.version = 11 : i64} {
  func.func @_ffn_kernel(%arg0: memref<8x16xf32, #tpu.memory_space<vmem>>, %arg1: memref<16x32xf32, #tpu.memory_space<vmem>>, %arg2: memref<1x32xf32, #tpu.memory_space<vmem>>, %arg3: memref<32x16xf32, #tpu.memory_space<vmem>>, %arg4: memref<1x16xf32, #tpu.memory_space<vmem>>, %arg5: memref<8x16xf32, #tpu.memory_space<vmem>>) attributes {dimension_semantics = [], scalar_prefetch = 0 : i64, scratch_operands = 0 : i64, tpu.core_type = #tpu.core_type<tc>} {
    %c0 = arith.constant 0 : index
    %c0_0 = arith.constant 0 : index
    %0 = vector.load %arg0[%c0, %c0_0] : memref<8x16xf32, #tpu.memory_space<vmem>>, vector<8x16xf32>
    %1 = arith.truncf %0 : vector<8x16xf32> to vector<8x16xbf16>
    %c0_1 = arith.constant 0 : index
    %c0_2 = arith.constant 0 : index
    %2 = vector.load %arg1[%c0_1, %c0_2] : memref<16x32xf32, #tpu.memory_space<vmem>>, vector<16x32xf32>
    %3 = arith.truncf %2 : vector<16x32xf32> to vector<16x32xbf16>
    %cst = arith.constant dense<0.000000e+00> : vector<8x32xf32>
    %4 = tpu.matmul %1, %3, %cst {dimension_numbers = #tpu.dot_dimension_numbers<[1], [0], [0], [1], [0, 0, 1, 1], [], []>} : vector<8x16xbf16>, vector<16x32xbf16>, vector<8x32xf32> -> vector<8x32xf32>
    %c0_3 = arith.constant 0 : index
    %c0_4 = arith.constant 0 : index
    %5 = vector.load %arg2[%c0_3, %c0_4] : memref<1x32xf32, #tpu.memory_space<vmem>>, vector<1x32xf32>
    %6 = vector.broadcast %5 : vector<1x32xf32> to vector<8x32xf32>
    %7 = arith.addf %4, %6 : vector<8x32xf32>
    %cst_5 = arith.constant 0.000000e+00 : f32
    %8 = vector.broadcast %cst_5 : f32 to vector<8x32xf32>
    %9 = arith.maximumf %7, %8 : vector<8x32xf32>
    %10 = arith.truncf %9 : vector<8x32xf32> to vector<8x32xbf16>
    %c0_6 = arith.constant 0 : index
    %c0_7 = arith.constant 0 : index
    %11 = vector.load %arg3[%c0_6, %c0_7] : memref<32x16xf32, #tpu.memory_space<vmem>>, vector<32x16xf32>
    %12 = arith.truncf %11 : vector<32x16xf32> to vector<32x16xbf16>
    %cst_8 = arith.constant dense<0.000000e+00> : vector<8x16xf32>
    %13 = tpu.matmul %10, %12, %cst_8 {dimension_numbers = #tpu.dot_dimension_numbers<[1], [0], [0], [1], [0, 0, 1, 1], [], []>} : vector<8x32xbf16>, vector<32x16xbf16>, vector<8x16xf32> -> vector<8x16xf32>
    %c0_9 = arith.constant 0 : index
    %c0_10 = arith.constant 0 : index
    %14 = vector.load %arg4[%c0_9, %c0_10] : memref<1x16xf32, #tpu.memory_space<vmem>>, vector<1x16xf32>
    %15 = vector.broadcast %14 : vector<1x16xf32> to vector<8x16xf32>
    %16 = arith.addf %13, %15 : vector<8x16xf32>
    %c0_11 = arith.constant 0 : index
    %c0_12 = arith.constant 0 : index
    %17 = vector.load %arg5[%c0_11, %c0_12] : memref<8x16xf32, #tpu.memory_space<vmem>>, vector<8x16xf32>
    tpu.vector_store %arg5[%c0_11, %c0_12], %16 {strides = array<i32>} : memref<8x16xf32, #tpu.memory_space<vmem>>, vector<8x16xf32>,
    return
  }
}

module attributes {stable_mosaic.version = 11 : i64} {
  func.func @_linear_kernel(%arg0: memref<2x16xf32, #tpu.memory_space<vmem>>, %arg1: memref<16x32xf32, #tpu.memory_space<vmem>>, %arg2: memref<1x32xf32, #tpu.memory_space<vmem>>, %arg3: memref<2x32xf32, #tpu.memory_space<vmem>>) attributes {dimension_semantics = [], scalar_prefetch = 0 : i64, scratch_operands = 0 : i64, tpu.core_type = #tpu.core_type<tc>} {
    %c0 = arith.constant 0 : index
    %c0_0 = arith.constant 0 : index
    %0 = vector.load %arg0[%c0, %c0_0] : memref<2x16xf32, #tpu.memory_space<vmem>>, vector<2x16xf32>
    %1 = arith.truncf %0 : vector<2x16xf32> to vector<2x16xbf16>
    %c0_1 = arith.constant 0 : index
    %c0_2 = arith.constant 0 : index
    %2 = vector.load %arg1[%c0_1, %c0_2] : memref<16x32xf32, #tpu.memory_space<vmem>>, vector<16x32xf32>
    %3 = arith.truncf %2 : vector<16x32xf32> to vector<16x32xbf16>
    %cst = arith.constant dense<0.000000e+00> : vector<2x32xf32>
    %4 = tpu.matmul %1, %3, %cst {dimension_numbers = #tpu.dot_dimension_numbers<[1], [0], [0], [1], [0, 0, 1, 1], [], []>} : vector<2x16xbf16>, vector<16x32xbf16>, vector<2x32xf32> -> vector<2x32xf32>
    %c0_3 = arith.constant 0 : index
    %c0_4 = arith.constant 0 : index
    %5 = vector.load %arg2[%c0_3, %c0_4] : memref<1x32xf32, #tpu.memory_space<vmem>>, vector<1x32xf32>
    %6 = vector.broadcast %5 : vector<1x32xf32> to vector<2x32xf32>
    %7 = arith.addf %4, %6 : vector<2x32xf32>
    %c0_5 = arith.constant 0 : index
    %c0_6 = arith.constant 0 : index
    %8 = vector.load %arg3[%c0_5, %c0_6] : memref<2x32xf32, #tpu.memory_space<vmem>>, vector<2x32xf32>
    tpu.vector_store %arg3[%c0_5, %c0_6], %7 {strides = array<i32>} : memref<2x32xf32, #tpu.memory_space<vmem>>, vector<2x32xf32>,
    return
  }
}

module attributes {stable_mosaic.version = 11 : i64} {
  func.func @_linear_kernel(%arg0: memref<2x32xf32, #tpu.memory_space<vmem>>, %arg1: memref<32x32xf32, #tpu.memory_space<vmem>>, %arg2: memref<1x32xf32, #tpu.memory_space<vmem>>, %arg3: memref<2x32xf32, #tpu.memory_space<vmem>>) attributes {dimension_semantics = [], scalar_prefetch = 0 : i64, scratch_operands = 0 : i64, tpu.core_type = #tpu.core_type<tc>} {
    %c0 = arith.constant 0 : index
    %c0_0 = arith.constant 0 : index
    %0 = vector.load %arg0[%c0, %c0_0] : memref<2x32xf32, #tpu.memory_space<vmem>>, vector<2x32xf32>
    %1 = arith.truncf %0 : vector<2x32xf32> to vector<2x32xbf16>
    %c0_1 = arith.constant 0 : index
    %c0_2 = arith.constant 0 : index
    %2 = vector.load %arg1[%c0_1, %c0_2] : memref<32x32xf32, #tpu.memory_space<vmem>>, vector<32x32xf32>
    %3 = arith.truncf %2 : vector<32x32xf32> to vector<32x32xbf16>
    %cst = arith.constant dense<0.000000e+00> : vector<2x32xf32>
    %4 = tpu.matmul %1, %3, %cst {dimension_numbers = #tpu.dot_dimension_numbers<[1], [0], [0], [1], [0, 0, 1, 1], [], []>} : vector<2x32xbf16>, vector<32x32xbf16>, vector<2x32xf32> -> vector<2x32xf32>
    %c0_3 = arith.constant 0 : index
    %c0_4 = arith.constant 0 : index
    %5 = vector.load %arg2[%c0_3, %c0_4] : memref<1x32xf32, #tpu.memory_space<vmem>>, vector<1x32xf32>
    %6 = vector.broadcast %5 : vector<1x32xf32> to vector<2x32xf32>
    %7 = arith.addf %4, %6 : vector<2x32xf32>
    %c0_5 = arith.constant 0 : index
    %c0_6 = arith.constant 0 : index
    %8 = vector.load %arg3[%c0_5, %c0_6] : memref<2x32xf32, #tpu.memory_space<vmem>>, vector<2x32xf32>
    tpu.vector_store %arg3[%c0_5, %c0_6], %7 {strides = array<i32>} : memref<2x32xf32, #tpu.memory_space<vmem>>, vector<2x32xf32>,
    return
  }
}

module attributes {stable_mosaic.version = 11 : i64} {
  func.func @_linear_kernel(%arg0: memref<1x16xf32, #tpu.memory_space<vmem>>, %arg1: memref<16x32xf32, #tpu.memory_space<vmem>>, %arg2: memref<1x32xf32, #tpu.memory_space<vmem>>, %arg3: memref<1x32xf32, #tpu.memory_space<vmem>>) attributes {dimension_semantics = [], scalar_prefetch = 0 : i64, scratch_operands = 0 : i64, tpu.core_type = #tpu.core_type<tc>} {
    %c0 = arith.constant 0 : index
    %c0_0 = arith.constant 0 : index
    %0 = vector.load %arg0[%c0, %c0_0] : memref<1x16xf32, #tpu.memory_space<vmem>>, vector<1x16xf32>
    %1 = arith.truncf %0 : vector<1x16xf32> to vector<1x16xbf16>
    %c0_1 = arith.constant 0 : index
    %c0_2 = arith.constant 0 : index
    %2 = vector.load %arg1[%c0_1, %c0_2] : memref<16x32xf32, #tpu.memory_space<vmem>>, vector<16x32xf32>
    %3 = arith.truncf %2 : vector<16x32xf32> to vector<16x32xbf16>
    %cst = arith.constant dense<0.000000e+00> : vector<1x32xf32>
    %4 = tpu.matmul %1, %3, %cst {dimension_numbers = #tpu.dot_dimension_numbers<[1], [0], [0], [1], [0, 0, 1, 1], [], []>} : vector<1x16xbf16>, vector<16x32xbf16>, vector<1x32xf32> -> vector<1x32xf32>
    %c0_3 = arith.constant 0 : index
    %c0_4 = arith.constant 0 : index
    %5 = vector.load %arg2[%c0_3, %c0_4] : memref<1x32xf32, #tpu.memory_space<vmem>>, vector<1x32xf32>
    %6 = arith.addf %4, %5 : vector<1x32xf32>
    %c0_5 = arith.constant 0 : index
    %c0_6 = arith.constant 0 : index
    %7 = vector.load %arg3[%c0_5, %c0_6] : memref<1x32xf32, #tpu.memory_space<vmem>>, vector<1x32xf32>
    tpu.vector_store %arg3[%c0_5, %c0_6], %6 {strides = array<i32>} : memref<1x32xf32, #tpu.memory_space<vmem>>, vector<1x32xf32>,
    return
  }
}

module attributes {stable_mosaic.version = 11 : i64} {
  func.func @_linear_kernel(%arg0: memref<2x32xf32, #tpu.memory_space<vmem>>, %arg1: memref<32x96xf32, #tpu.memory_space<vmem>>, %arg2: memref<1x96xf32, #tpu.memory_space<vmem>>, %arg3: memref<2x96xf32, #tpu.memory_space<vmem>>) attributes {dimension_semantics = [], scalar_prefetch = 0 : i64, scratch_operands = 0 : i64, tpu.core_type = #tpu.core_type<tc>} {
    %c0 = arith.constant 0 : index
    %c0_0 = arith.constant 0 : index
    %0 = vector.load %arg0[%c0, %c0_0] : memref<2x32xf32, #tpu.memory_space<vmem>>, vector<2x32xf32>
    %1 = arith.truncf %0 : vector<2x32xf32> to vector<2x32xbf16>
    %c0_1 = arith.constant 0 : index
    %c0_2 = arith.constant 0 : index
    %2 = vector.load %arg1[%c0_1, %c0_2] : memref<32x96xf32, #tpu.memory_space<vmem>>, vector<32x96xf32>
    %3 = arith.truncf %2 : vector<32x96xf32> to vector<32x96xbf16>
    %cst = arith.constant dense<0.000000e+00> : vector<2x96xf32>
    %4 = tpu.matmul %1, %3, %cst {dimension_numbers = #tpu.dot_dimension_numbers<[1], [0], [0], [1], [0, 0, 1, 1], [], []>} : vector<2x32xbf16>, vector<32x96xbf16>, vector<2x96xf32> -> vector<2x96xf32>
    %c0_3 = arith.constant 0 : index
    %c0_4 = arith.constant 0 : index
    %5 = vector.load %arg2[%c0_3, %c0_4] : memref<1x96xf32, #tpu.memory_space<vmem>>, vector<1x96xf32>
    %6 = vector.broadcast %5 : vector<1x96xf32> to vector<2x96xf32>
    %7 = arith.addf %4, %6 : vector<2x96xf32>
    %c0_5 = arith.constant 0 : index
    %c0_6 = arith.constant 0 : index
    %8 = vector.load %arg3[%c0_5, %c0_6] : memref<2x96xf32, #tpu.memory_space<vmem>>, vector<2x96xf32>
    tpu.vector_store %arg3[%c0_5, %c0_6], %7 {strides = array<i32>} : memref<2x96xf32, #tpu.memory_space<vmem>>, vector<2x96xf32>,
    return
  }
}

module attributes {stable_mosaic.version = 11 : i64} {
  func.func @_attn_kernel(%arg0: i32, %arg1: memref<2xi32, #tpu.memory_space<smem>>, %arg2: memref<1x1x32xf32, #tpu.memory_space<vmem>>, %arg3: memref<1x5x32xf32, #tpu.memory_space<vmem>>, %arg4: memref<1x5x32xf32, #tpu.memory_space<vmem>>, %arg5: memref<1x1x32xf32, #tpu.memory_space<vmem>>) attributes {dimension_semantics = [#tpu.dimension_semantics<parallel>], iteration_bounds = array<i64: 2>, scalar_prefetch = 1 : i64, scratch_operands = 0 : i64, tpu.core_type = #tpu.core_type<tc>, window_params = [{transform_indices = @transform_0, window_bounds = array<i64: 1, 1, 32>}, {transform_indices = @transform_1, window_bounds = array<i64: 1, 5, 32>}, {transform_indices = @transform_2, window_bounds = array<i64: 1, 5, 32>}, {transform_indices = @transform_3, window_bounds = array<i64: 1, 1, 32>}]} {
    %0 = arith.index_cast %arg0 : i32 to index
    %1 = memref.load %arg1[%0] : memref<2xi32, #tpu.memory_space<smem>>
    %2 = tpu.iota {dimensions = array<i32: 1>} : vector<1x5xi32>
    %3 = vector.broadcast %1 : i32 to vector<1x5xi32>
    %4 = arith.cmpi slt, %2, %3 : vector<1x5xi32>
    %cst = arith.constant 0.000000e+00 : f32
    %cst_0 = arith.constant -1.000000e+09 : f32
    %5 = vector.broadcast %cst : f32 to vector<1x5xf32>
    %6 = vector.broadcast %cst_0 : f32 to vector<1x5xf32>
    %7 = arith.select %4, %5, %6 : vector<1x5xi1>, vector<1x5xf32>
    %c0 = arith.constant 0 : index
    %c0_1 = arith.constant 0 : index
    %c0_2 = arith.constant 0 : index
    %8 = vector.load %arg2[%c0, %c0_1, %c0_2] : memref<1x1x32xf32, #tpu.memory_space<vmem>>, vector<1x1x32xf32>
    %9 = vector.shape_cast %8 : vector<1x1x32xf32> to vector<1x32xf32>
    %c0_3 = arith.constant 0 : index
    %c0_4 = arith.constant 0 : index
    %c0_5 = arith.constant 0 : index
    %10 = vector.load %arg3[%c0_3, %c0_4, %c0_5] : memref<1x5x32xf32, #tpu.memory_space<vmem>>, vector<1x5x32xf32>
    %11 = vector.shape_cast %10 : vector<1x5x32xf32> to vector<5x32xf32>
    %c0_6 = arith.constant 0 : index
    %c0_7 = arith.constant 0 : index
    %c0_8 = arith.constant 0 : index
    %12 = vector.load %arg4[%c0_6, %c0_7, %c0_8] : memref<1x5x32xf32, #tpu.memory_space<vmem>>, vector<1x5x32xf32>
    %13 = vector.shape_cast %12 : vector<1x5x32xf32> to vector<5x32xf32>
    %14 = vector.extract_strided_slice %9 {offsets = [0, 0], sizes = [1, 16], strides = [1, 1]} : vector<1x32xf32> to vector<1x16xf32>
    %15 = arith.truncf %14 : vector<1x16xf32> to vector<1x16xbf16>
    %16 = vector.extract_strided_slice %11 {offsets = [0, 0], sizes = [5, 16], strides = [1, 1]} : vector<5x32xf32> to vector<5x16xf32>
    %17 = arith.truncf %16 : vector<5x16xf32> to vector<5x16xbf16>
    %18 = vector.extract_strided_slice %13 {offsets = [0, 0], sizes = [5, 16], strides = [1, 1]} : vector<5x32xf32> to vector<5x16xf32>
    %19 = arith.truncf %18 : vector<5x16xf32> to vector<5x16xbf16>
    %cst_9 = arith.constant dense<0.000000e+00> : vector<1x5xf32>
    %20 = tpu.matmul %15, %17, %cst_9 {dimension_numbers = #tpu.dot_dimension_numbers<[1], [1], [0], [0], [0, 0, 1, 0], [], []>} : vector<1x16xbf16>, vector<5x16xbf16>, vector<1x5xf32> -> vector<1x5xf32>
    %21 = arith.addf %20, %7 : vector<1x5xf32>
    %cst_10 = arith.constant dense<0xFF800000> : vector<1xf32>
    %22 = vector.multi_reduction <maximumf>, %21, %cst_10 [1] : vector<1x5xf32> to vector<1xf32>
    %23 = vector.shape_cast %22 : vector<1xf32> to vector<1x1xf32>
    %24 = vector.broadcast %23 : vector<1x1xf32> to vector<1x5xf32>
    %25 = arith.subf %21, %24 : vector<1x5xf32>
    %26 = math.exp %25 : vector<1x5xf32>
    %cst_11 = arith.constant dense<0.000000e+00> : vector<1xf32>
    %27 = vector.multi_reduction <add>, %26, %cst_11 [1] : vector<1x5xf32> to vector<1xf32>
    %28 = vector.shape_cast %27 : vector<1xf32> to vector<1x1xf32>
    %29 = tpu.reciprocal %28 {approx = true} : vector<1x1xf32> -> vector<1x1xf32>
    %30 = vector.broadcast %29 : vector<1x1xf32> to vector<1x5xf32>
    %31 = arith.mulf %26, %30 : vector<1x5xf32>
    %32 = arith.truncf %31 : vector<1x5xf32> to vector<1x5xbf16>
    %cst_12 = arith.constant dense<0.000000e+00> : vector<1x16xf32>
    %33 = tpu.matmul %32, %19, %cst_12 {dimension_numbers = #tpu.dot_dimension_numbers<[1], [0], [0], [1], [0, 0, 1, 1], [], []>} : vector<1x5xbf16>, vector<5x16xbf16>, vector<1x16xf32> -> vector<1x16xf32>
    %34 = vector.extract_strided_slice %9 {offsets = [0, 16], sizes = [1, 16], strides = [1, 1]} : vector<1x32xf32> to vector<1x16xf32>
    %35 = arith.truncf %34 : vector<1x16xf32> to vector<1x16xbf16>
    %36 = vector.extract_strided_slice %11 {offsets = [0, 16], sizes = [5, 16], strides = [1, 1]} : vector<5x32xf32> to vector<5x16xf32>
    %37 = arith.truncf %36 : vector<5x16xf32> to vector<5x16xbf16>
    %38 = vector.extract_strided_slice %13 {offsets = [0, 16], sizes = [5, 16], strides = [1, 1]} : vector<5x32xf32> to vector<5x16xf32>
    %39 = arith.truncf %38 : vector<5x16xf32> to vector<5x16xbf16>
    %cst_13 = arith.constant dense<0.000000e+00> : vector<1x5xf32>
    %40 = tpu.matmul %35, %37, %cst_13 {dimension_numbers = #tpu.dot_dimension_numbers<[1], [1], [0], [0], [0, 0, 1, 0], [], []>} : vector<1x16xbf16>, vector<5x16xbf16>, vector<1x5xf32> -> vector<1x5xf32>
    %41 = arith.addf %40, %7 : vector<1x5xf32>
    %cst_14 = arith.constant dense<0xFF800000> : vector<1xf32>
    %42 = vector.multi_reduction <maximumf>, %41, %cst_14 [1] : vector<1x5xf32> to vector<1xf32>
    %43 = vector.shape_cast %42 : vector<1xf32> to vector<1x1xf32>
    %44 = vector.broadcast %43 : vector<1x1xf32> to vector<1x5xf32>
    %45 = arith.subf %41, %44 : vector<1x5xf32>
    %46 = math.exp %45 : vector<1x5xf32>
    %cst_15 = arith.constant dense<0.000000e+00> : vector<1xf32>
    %47 = vector.multi_reduction <add>, %46, %cst_15 [1] : vector<1x5xf32> to vector<1xf32>
    %48 = vector.shape_cast %47 : vector<1xf32> to vector<1x1xf32>
    %49 = tpu.reciprocal %48 {approx = true} : vector<1x1xf32> -> vector<1x1xf32>
    %50 = vector.broadcast %49 : vector<1x1xf32> to vector<1x5xf32>
    %51 = arith.mulf %46, %50 : vector<1x5xf32>
    %52 = arith.truncf %51 : vector<1x5xf32> to vector<1x5xbf16>
    %cst_16 = arith.constant dense<0.000000e+00> : vector<1x16xf32>
    %53 = tpu.matmul %52, %39, %cst_16 {dimension_numbers = #tpu.dot_dimension_numbers<[1], [0], [0], [1], [0, 0, 1, 1], [], []>} : vector<1x5xbf16>, vector<5x16xbf16>, vector<1x16xf32> -> vector<1x16xf32>
    %54 = tpu.concatenate %33, %53 in 1 : vector<1x16xf32>, vector<1x16xf32> -> vector<1x32xf32>
    %c0_17 = arith.constant 0 : index
    %c0_18 = arith.constant 0 : index
    %c0_19 = arith.constant 0 : index
    %55 = vector.load %arg5[%c0_17, %c0_18, %c0_19] : memref<1x1x32xf32, #tpu.memory_space<vmem>>, vector<1x1x32xf32>
    %56 = vector.shape_cast %55 : vector<1x1x32xf32> to vector<1x32xf32>
    %57 = vector.shape_cast %54 : vector<1x32xf32> to vector<1x1x32xf32>
    tpu.vector_store %arg5[%c0_17, %c0_18, %c0_19], %57 {strides = array<i32>} : memref<1x1x32xf32, #tpu.memory_space<vmem>>, vector<1x1x32xf32>,
    return
  }
  func.func @transform_0(%arg0: i32, %arg1: memref<2xi32, #tpu.memory_space<smem>>) -> (i32, i32, i32) {
    %c0_i32 = arith.constant 0 : i32
    %c0_i32_0 = arith.constant 0 : i32
    %c0_i32_1 = arith.constant 0 : i32
    return %arg0, %c0_i32, %c0_i32_0 : i32, i32, i32
  }
  func.func @transform_1(%arg0: i32, %arg1: memref<2xi32, #tpu.memory_space<smem>>) -> (i32, i32, i32) {
    %c0_i32 = arith.constant 0 : i32
    %c0_i32_0 = arith.constant 0 : i32
    %c0_i32_1 = arith.constant 0 : i32
    return %arg0, %c0_i32, %c0_i32_0 : i32, i32, i32
  }
  func.func @transform_2(%arg0: i32, %arg1: memref<2xi32, #tpu.memory_space<smem>>) -> (i32, i32, i32) {
    %c0_i32 = arith.constant 0 : i32
    %c0_i32_0 = arith.constant 0 : i32
    %c0_i32_1 = arith.constant 0 : i32
    return %arg0, %c0_i32, %c0_i32_0 : i32, i32, i32
  }
  func.func @transform_3(%arg0: i32, %arg1: memref<2xi32, #tpu.memory_space<smem>>) -> (i32, i32, i32) {
    %c0_i32 = arith.constant 0 : i32
    %c0_i32_0 = arith.constant 0 : i32
    %c0_i32_1 = arith.constant 0 : i32
    return %arg0, %c0_i32, %c0_i32_0 : i32, i32, i32
  }
}

module attributes {stable_mosaic.version = 11 : i64} {
  func.func @_ffn_kernel(%arg0: memref<2x32xf32, #tpu.memory_space<vmem>>, %arg1: memref<32x64xf32, #tpu.memory_space<vmem>>, %arg2: memref<1x64xf32, #tpu.memory_space<vmem>>, %arg3: memref<64x32xf32, #tpu.memory_space<vmem>>, %arg4: memref<1x32xf32, #tpu.memory_space<vmem>>, %arg5: memref<2x32xf32, #tpu.memory_space<vmem>>) attributes {dimension_semantics = [], scalar_prefetch = 0 : i64, scratch_operands = 0 : i64, tpu.core_type = #tpu.core_type<tc>} {
    %c0 = arith.constant 0 : index
    %c0_0 = arith.constant 0 : index
    %0 = vector.load %arg0[%c0, %c0_0] : memref<2x32xf32, #tpu.memory_space<vmem>>, vector<2x32xf32>
    %1 = arith.truncf %0 : vector<2x32xf32> to vector<2x32xbf16>
    %c0_1 = arith.constant 0 : index
    %c0_2 = arith.constant 0 : index
    %2 = vector.load %arg1[%c0_1, %c0_2] : memref<32x64xf32, #tpu.memory_space<vmem>>, vector<32x64xf32>
    %3 = arith.truncf %2 : vector<32x64xf32> to vector<32x64xbf16>
    %cst = arith.constant dense<0.000000e+00> : vector<2x64xf32>
    %4 = tpu.matmul %1, %3, %cst {dimension_numbers = #tpu.dot_dimension_numbers<[1], [0], [0], [1], [0, 0, 1, 1], [], []>} : vector<2x32xbf16>, vector<32x64xbf16>, vector<2x64xf32> -> vector<2x64xf32>
    %c0_3 = arith.constant 0 : index
    %c0_4 = arith.constant 0 : index
    %5 = vector.load %arg2[%c0_3, %c0_4] : memref<1x64xf32, #tpu.memory_space<vmem>>, vector<1x64xf32>
    %6 = vector.broadcast %5 : vector<1x64xf32> to vector<2x64xf32>
    %7 = arith.addf %4, %6 : vector<2x64xf32>
    %cst_5 = arith.constant 0.000000e+00 : f32
    %8 = vector.broadcast %cst_5 : f32 to vector<2x64xf32>
    %9 = arith.maximumf %7, %8 : vector<2x64xf32>
    %10 = arith.truncf %9 : vector<2x64xf32> to vector<2x64xbf16>
    %c0_6 = arith.constant 0 : index
    %c0_7 = arith.constant 0 : index
    %11 = vector.load %arg3[%c0_6, %c0_7] : memref<64x32xf32, #tpu.memory_space<vmem>>, vector<64x32xf32>
    %12 = arith.truncf %11 : vector<64x32xf32> to vector<64x32xbf16>
    %cst_8 = arith.constant dense<0.000000e+00> : vector<2x32xf32>
    %13 = tpu.matmul %10, %12, %cst_8 {dimension_numbers = #tpu.dot_dimension_numbers<[1], [0], [0], [1], [0, 0, 1, 1], [], []>} : vector<2x64xbf16>, vector<64x32xbf16>, vector<2x32xf32> -> vector<2x32xf32>
    %c0_9 = arith.constant 0 : index
    %c0_10 = arith.constant 0 : index
    %14 = vector.load %arg4[%c0_9, %c0_10] : memref<1x32xf32, #tpu.memory_space<vmem>>, vector<1x32xf32>
    %15 = vector.broadcast %14 : vector<1x32xf32> to vector<2x32xf32>
    %16 = arith.addf %13, %15 : vector<2x32xf32>
    %c0_11 = arith.constant 0 : index
    %c0_12 = arith.constant 0 : index
    %17 = vector.load %arg5[%c0_11, %c0_12] : memref<2x32xf32, #tpu.memory_space<vmem>>, vector<2x32xf32>
    tpu.vector_store %arg5[%c0_11, %c0_12], %16 {strides = array<i32>} : memref<2x32xf32, #tpu.memory_space<vmem>>, vector<2x32xf32>,
    return
  }
}

module attributes {stable_mosaic.version = 11 : i64} {
  func.func @_linear_kernel(%arg0: memref<2x32xf32, #tpu.memory_space<vmem>>, %arg1: memref<32x64xf32, #tpu.memory_space<vmem>>, %arg2: memref<1x64xf32, #tpu.memory_space<vmem>>, %arg3: memref<2x64xf32, #tpu.memory_space<vmem>>) attributes {dimension_semantics = [], scalar_prefetch = 0 : i64, scratch_operands = 0 : i64, tpu.core_type = #tpu.core_type<tc>} {
    %c0 = arith.constant 0 : index
    %c0_0 = arith.constant 0 : index
    %0 = vector.load %arg0[%c0, %c0_0] : memref<2x32xf32, #tpu.memory_space<vmem>>, vector<2x32xf32>
    %1 = arith.truncf %0 : vector<2x32xf32> to vector<2x32xbf16>
    %c0_1 = arith.constant 0 : index
    %c0_2 = arith.constant 0 : index
    %2 = vector.load %arg1[%c0_1, %c0_2] : memref<32x64xf32, #tpu.memory_space<vmem>>, vector<32x64xf32>
    %3 = arith.truncf %2 : vector<32x64xf32> to vector<32x64xbf16>
    %cst = arith.constant dense<0.000000e+00> : vector<2x64xf32>
    %4 = tpu.matmul %1, %3, %cst {dimension_numbers = #tpu.dot_dimension_numbers<[1], [0], [0], [1], [0, 0, 1, 1], [], []>} : vector<2x32xbf16>, vector<32x64xbf16>, vector<2x64xf32> -> vector<2x64xf32>
    %c0_3 = arith.constant 0 : index
    %c0_4 = arith.constant 0 : index
    %5 = vector.load %arg2[%c0_3, %c0_4] : memref<1x64xf32, #tpu.memory_space<vmem>>, vector<1x64xf32>
    %6 = vector.broadcast %5 : vector<1x64xf32> to vector<2x64xf32>
    %7 = arith.addf %4, %6 : vector<2x64xf32>
    %c0_5 = arith.constant 0 : index
    %c0_6 = arith.constant 0 : index
    %8 = vector.load %arg3[%c0_5, %c0_6] : memref<2x64xf32, #tpu.memory_space<vmem>>, vector<2x64xf32>
    tpu.vector_store %arg3[%c0_5, %c0_6], %7 {strides = array<i32>} : memref<2x64xf32, #tpu.memory_space<vmem>>, vector<2x64xf32>,
    return
  }
}

module attributes {stable_mosaic.version = 11 : i64} {
  func.func @_attn_kernel(%arg0: i32, %arg1: memref<2xi32, #tpu.memory_space<smem>>, %arg2: memref<1x1x32xf32, #tpu.memory_space<vmem>>, %arg3: memref<1x4x32xf32, #tpu.memory_space<vmem>>, %arg4: memref<1x4x32xf32, #tpu.memory_space<vmem>>, %arg5: memref<1x1x32xf32, #tpu.memory_space<vmem>>) attributes {dimension_semantics = [#tpu.dimension_semantics<parallel>], iteration_bounds = array<i64: 2>, scalar_prefetch = 1 : i64, scratch_operands = 0 : i64, tpu.core_type = #tpu.core_type<tc>, window_params = [{transform_indices = @transform_0, window_bounds = array<i64: 1, 1, 32>}, {transform_indices = @transform_1, window_bounds = array<i64: 1, 4, 32>}, {transform_indices = @transform_2, window_bounds = array<i64: 1, 4, 32>}, {transform_indices = @transform_3, window_bounds = array<i64: 1, 1, 32>}]} {
    %0 = arith.index_cast %arg0 : i32 to index
    %1 = memref.load %arg1[%0] : memref<2xi32, #tpu.memory_space<smem>>
    %2 = tpu.iota {dimensions = array<i32: 1>} : vector<1x4xi32>
    %3 = vector.broadcast %1 : i32 to vector<1x4xi32>
    %4 = arith.cmpi slt, %2, %3 : vector<1x4xi32>
    %cst = arith.constant 0.000000e+00 : f32
    %cst_0 = arith.constant -1.000000e+09 : f32
    %5 = vector.broadcast %cst : f32 to vector<1x4xf32>
    %6 = vector.broadcast %cst_0 : f32 to vector<1x4xf32>
    %7 = arith.select %4, %5, %6 : vector<1x4xi1>, vector<1x4xf32>
    %c0 = arith.constant 0 : index
    %c0_1 = arith.constant 0 : index
    %c0_2 = arith.constant 0 : index
    %8 = vector.load %arg2[%c0, %c0_1, %c0_2] : memref<1x1x32xf32, #tpu.memory_space<vmem>>, vector<1x1x32xf32>
    %9 = vector.shape_cast %8 : vector<1x1x32xf32> to vector<1x32xf32>
    %c0_3 = arith.constant 0 : index
    %c0_4 = arith.constant 0 : index
    %c0_5 = arith.constant 0 : index
    %10 = vector.load %arg3[%c0_3, %c0_4, %c0_5] : memref<1x4x32xf32, #tpu.memory_space<vmem>>, vector<1x4x32xf32>
    %11 = vector.shape_cast %10 : vector<1x4x32xf32> to vector<4x32xf32>
    %c0_6 = arith.constant 0 : index
    %c0_7 = arith.constant 0 : index
    %c0_8 = arith.constant 0 : index
    %12 = vector.load %arg4[%c0_6, %c0_7, %c0_8] : memref<1x4x32xf32, #tpu.memory_space<vmem>>, vector<1x4x32xf32>
    %13 = vector.shape_cast %12 : vector<1x4x32xf32> to vector<4x32xf32>
    %14 = vector.extract_strided_slice %9 {offsets = [0, 0], sizes = [1, 16], strides = [1, 1]} : vector<1x32xf32> to vector<1x16xf32>
    %15 = arith.truncf %14 : vector<1x16xf32> to vector<1x16xbf16>
    %16 = vector.extract_strided_slice %11 {offsets = [0, 0], sizes = [4, 16], strides = [1, 1]} : vector<4x32xf32> to vector<4x16xf32>
    %17 = arith.truncf %16 : vector<4x16xf32> to vector<4x16xbf16>
    %18 = vector.extract_strided_slice %13 {offsets = [0, 0], sizes = [4, 16], strides = [1, 1]} : vector<4x32xf32> to vector<4x16xf32>
    %19 = arith.truncf %18 : vector<4x16xf32> to vector<4x16xbf16>
    %cst_9 = arith.constant dense<0.000000e+00> : vector<1x4xf32>
    %20 = tpu.matmul %15, %17, %cst_9 {dimension_numbers = #tpu.dot_dimension_numbers<[1], [1], [0], [0], [0, 0, 1, 0], [], []>} : vector<1x16xbf16>, vector<4x16xbf16>, vector<1x4xf32> -> vector<1x4xf32>
    %21 = arith.addf %20, %7 : vector<1x4xf32>
    %cst_10 = arith.constant dense<0xFF800000> : vector<1xf32>
    %22 = vector.multi_reduction <maximumf>, %21, %cst_10 [1] : vector<1x4xf32> to vector<1xf32>
    %23 = vector.shape_cast %22 : vector<1xf32> to vector<1x1xf32>
    %24 = vector.broadcast %23 : vector<1x1xf32> to vector<1x4xf32>
    %25 = arith.subf %21, %24 : vector<1x4xf32>
    %26 = math.exp %25 : vector<1x4xf32>
    %cst_11 = arith.constant dense<0.000000e+00> : vector<1xf32>
    %27 = vector.multi_reduction <add>, %26, %cst_11 [1] : vector<1x4xf32> to vector<1xf32>
    %28 = vector.shape_cast %27 : vector<1xf32> to vector<1x1xf32>
    %29 = tpu.reciprocal %28 {approx = true} : vector<1x1xf32> -> vector<1x1xf32>
    %30 = vector.broadcast %29 : vector<1x1xf32> to vector<1x4xf32>
    %31 = arith.mulf %26, %30 : vector<1x4xf32>
    %32 = arith.truncf %31 : vector<1x4xf32> to vector<1x4xbf16>
    %cst_12 = arith.constant dense<0.000000e+00> : vector<1x16xf32>
    %33 = tpu.matmul %32, %19, %cst_12 {dimension_numbers = #tpu.dot_dimension_numbers<[1], [0], [0], [1], [0, 0, 1, 1], [], []>} : vector<1x4xbf16>, vector<4x16xbf16>, vector<1x16xf32> -> vector<1x16xf32>
    %34 = vector.extract_strided_slice %9 {offsets = [0, 16], sizes = [1, 16], strides = [1, 1]} : vector<1x32xf32> to vector<1x16xf32>
    %35 = arith.truncf %34 : vector<1x16xf32> to vector<1x16xbf16>
    %36 = vector.extract_strided_slice %11 {offsets = [0, 16], sizes = [4, 16], strides = [1, 1]} : vector<4x32xf32> to vector<4x16xf32>
    %37 = arith.truncf %36 : vector<4x16xf32> to vector<4x16xbf16>
    %38 = vector.extract_strided_slice %13 {offsets = [0, 16], sizes = [4, 16], strides = [1, 1]} : vector<4x32xf32> to vector<4x16xf32>
    %39 = arith.truncf %38 : vector<4x16xf32> to vector<4x16xbf16>
    %cst_13 = arith.constant dense<0.000000e+00> : vector<1x4xf32>
    %40 = tpu.matmul %35, %37, %cst_13 {dimension_numbers = #tpu.dot_dimension_numbers<[1], [1], [0], [0], [0, 0, 1, 0], [], []>} : vector<1x16xbf16>, vector<4x16xbf16>, vector<1x4xf32> -> vector<1x4xf32>
    %41 = arith.addf %40, %7 : vector<1x4xf32>
    %cst_14 = arith.constant dense<0xFF800000> : vector<1xf32>
    %42 = vector.multi_reduction <maximumf>, %41, %cst_14 [1] : vector<1x4xf32> to vector<1xf32>
    %43 = vector.shape_cast %42 : vector<1xf32> to vector<1x1xf32>
    %44 = vector.broadcast %43 : vector<1x1xf32> to vector<1x4xf32>
    %45 = arith.subf %41, %44 : vector<1x4xf32>
    %46 = math.exp %45 : vector<1x4xf32>
    %cst_15 = arith.constant dense<0.000000e+00> : vector<1xf32>
    %47 = vector.multi_reduction <add>, %46, %cst_15 [1] : vector<1x4xf32> to vector<1xf32>
    %48 = vector.shape_cast %47 : vector<1xf32> to vector<1x1xf32>
    %49 = tpu.reciprocal %48 {approx = true} : vector<1x1xf32> -> vector<1x1xf32>
    %50 = vector.broadcast %49 : vector<1x1xf32> to vector<1x4xf32>
    %51 = arith.mulf %46, %50 : vector<1x4xf32>
    %52 = arith.truncf %51 : vector<1x4xf32> to vector<1x4xbf16>
    %cst_16 = arith.constant dense<0.000000e+00> : vector<1x16xf32>
    %53 = tpu.matmul %52, %39, %cst_16 {dimension_numbers = #tpu.dot_dimension_numbers<[1], [0], [0], [1], [0, 0, 1, 1], [], []>} : vector<1x4xbf16>, vector<4x16xbf16>, vector<1x16xf32> -> vector<1x16xf32>
    %54 = tpu.concatenate %33, %53 in 1 : vector<1x16xf32>, vector<1x16xf32> -> vector<1x32xf32>
    %c0_17 = arith.constant 0 : index
    %c0_18 = arith.constant 0 : index
    %c0_19 = arith.constant 0 : index
    %55 = vector.load %arg5[%c0_17, %c0_18, %c0_19] : memref<1x1x32xf32, #tpu.memory_space<vmem>>, vector<1x1x32xf32>
    %56 = vector.shape_cast %55 : vector<1x1x32xf32> to vector<1x32xf32>
    %57 = vector.shape_cast %54 : vector<1x32xf32> to vector<1x1x32xf32>
    tpu.vector_store %arg5[%c0_17, %c0_18, %c0_19], %57 {strides = array<i32>} : memref<1x1x32xf32, #tpu.memory_space<vmem>>, vector<1x1x32xf32>,
    return
  }
  func.func @transform_0(%arg0: i32, %arg1: memref<2xi32, #tpu.memory_space<smem>>) -> (i32, i32, i32) {
    %c0_i32 = arith.constant 0 : i32
    %c0_i32_0 = arith.constant 0 : i32
    %c0_i32_1 = arith.constant 0 : i32
    return %arg0, %c0_i32, %c0_i32_0 : i32, i32, i32
  }
  func.func @transform_1(%arg0: i32, %arg1: memref<2xi32, #tpu.memory_space<smem>>) -> (i32, i32, i32) {
    %c0_i32 = arith.constant 0 : i32
    %c0_i32_0 = arith.constant 0 : i32
    %c0_i32_1 = arith.constant 0 : i32
    return %arg0, %c0_i32, %c0_i32_0 : i32, i32, i32
  }
  func.func @transform_2(%arg0: i32, %arg1: memref<2xi32, #tpu.memory_space<smem>>) -> (i32, i32, i32) {
    %c0_i32 = arith.constant 0 : i32
    %c0_i32_0 = arith.constant 0 : i32
    %c0_i32_1 = arith.constant 0 : i32
    return %arg0, %c0_i32, %c0_i32_0 : i32, i32, i32
  }
  func.func @transform_3(%arg0: i32, %arg1: memref<2xi32, #tpu.memory_space<smem>>) -> (i32, i32, i32) {
    %c0_i32 = arith.constant 0 : i32
    %c0_i32_0 = arith.constant 0 : i32
    %c0_i32_1 = arith.constant 0 : i32
    return %arg0, %c0_i32, %c0_i32_0 : i32, i32, i32
  }
}

module attributes {stable_mosaic.version = 11 : i64} {
  func.func @_linear_kernel(%arg0: memref<2x8xf32, #tpu.memory_space<vmem>>, %arg1: memref<8x32xf32, #tpu.memory_space<vmem>>, %arg2: memref<1x32xf32, #tpu.memory_space<vmem>>, %arg3: memref<2x32xf32, #tpu.memory_space<vmem>>) attributes {dimension_semantics = [], scalar_prefetch = 0 : i64, scratch_operands = 0 : i64, tpu.core_type = #tpu.core_type<tc>} {
    %c0 = arith.constant 0 : index
    %c0_0 = arith.constant 0 : index
    %0 = vector.load %arg0[%c0, %c0_0] : memref<2x8xf32, #tpu.memory_space<vmem>>, vector<2x8xf32>
    %1 = arith.truncf %0 : vector<2x8xf32> to vector<2x8xbf16>
    %c0_1 = arith.constant 0 : index
    %c0_2 = arith.constant 0 : index
    %2 = vector.load %arg1[%c0_1, %c0_2] : memref<8x32xf32, #tpu.memory_space<vmem>>, vector<8x32xf32>
    %3 = arith.truncf %2 : vector<8x32xf32> to vector<8x32xbf16>
    %cst = arith.constant dense<0.000000e+00> : vector<2x32xf32>
    %4 = tpu.matmul %1, %3, %cst {dimension_numbers = #tpu.dot_dimension_numbers<[1], [0], [0], [1], [0, 0, 1, 1], [], []>} : vector<2x8xbf16>, vector<8x32xbf16>, vector<2x32xf32> -> vector<2x32xf32>
    %c0_3 = arith.constant 0 : index
    %c0_4 = arith.constant 0 : index
    %5 = vector.load %arg2[%c0_3, %c0_4] : memref<1x32xf32, #tpu.memory_space<vmem>>, vector<1x32xf32>
    %6 = vector.broadcast %5 : vector<1x32xf32> to vector<2x32xf32>
    %7 = arith.addf %4, %6 : vector<2x32xf32>
    %c0_5 = arith.constant 0 : index
    %c0_6 = arith.constant 0 : index
    %8 = vector.load %arg3[%c0_5, %c0_6] : memref<2x32xf32, #tpu.memory_space<vmem>>, vector<2x32xf32>
    tpu.vector_store %arg3[%c0_5, %c0_6], %7 {strides = array<i32>} : memref<2x32xf32, #tpu.memory_space<vmem>>, vector<2x32xf32>,
    return
  }
}

module attributes {stable_mosaic.version = 11 : i64} {
  func.func @_linear_kernel(%arg0: memref<2x16xf32, #tpu.memory_space<vmem>>, %arg1: memref<16x16xf32, #tpu.memory_space<vmem>>, %arg2: memref<1x16xf32, #tpu.memory_space<vmem>>, %arg3: memref<2x16xf32, #tpu.memory_space<vmem>>) attributes {dimension_semantics = [], scalar_prefetch = 0 : i64, scratch_operands = 0 : i64, tpu.core_type = #tpu.core_type<tc>} {
    %c0 = arith.constant 0 : index
    %c0_0 = arith.constant 0 : index
    %0 = vector.load %arg0[%c0, %c0_0] : memref<2x16xf32, #tpu.memory_space<vmem>>, vector<2x16xf32>
    %1 = arith.truncf %0 : vector<2x16xf32> to vector<2x16xbf16>
    %c0_1 = arith.constant 0 : index
    %c0_2 = arith.constant 0 : index
    %2 = vector.load %arg1[%c0_1, %c0_2] : memref<16x16xf32, #tpu.memory_space<vmem>>, vector<16x16xf32>
    %3 = arith.truncf %2 : vector<16x16xf32> to vector<16x16xbf16>
    %cst = arith.constant dense<0.000000e+00> : vector<2x16xf32>
    %4 = tpu.matmul %1, %3, %cst {dimension_numbers = #tpu.dot_dimension_numbers<[1], [0], [0], [1], [0, 0, 1, 1], [], []>} : vector<2x16xbf16>, vector<16x16xbf16>, vector<2x16xf32> -> vector<2x16xf32>
    %c0_3 = arith.constant 0 : index
    %c0_4 = arith.constant 0 : index
    %5 = vector.load %arg2[%c0_3, %c0_4] : memref<1x16xf32, #tpu.memory_space<vmem>>, vector<1x16xf32>
    %6 = vector.broadcast %5 : vector<1x16xf32> to vector<2x16xf32>
    %7 = arith.addf %4, %6 : vector<2x16xf32>
    %c0_5 = arith.constant 0 : index
    %c0_6 = arith.constant 0 : index
    %8 = vector.load %arg3[%c0_5, %c0_6] : memref<2x16xf32, #tpu.memory_space<vmem>>, vector<2x16xf32>
    tpu.vector_store %arg3[%c0_5, %c0_6], %7 {strides = array<i32>} : memref<2x16xf32, #tpu.memory_space<vmem>>, vector<2x16xf32>,
    return
  }
}

module attributes {stable_mosaic.version = 11 : i64} {
  func.func @_linear_kernel(%arg0: memref<8x8xf32, #tpu.memory_space<vmem>>, %arg1: memref<8x32xf32, #tpu.memory_space<vmem>>, %arg2: memref<1x32xf32, #tpu.memory_space<vmem>>, %arg3: memref<8x32xf32, #tpu.memory_space<vmem>>) attributes {dimension_semantics = [], scalar_prefetch = 0 : i64, scratch_operands = 0 : i64, tpu.core_type = #tpu.core_type<tc>} {
    %c0 = arith.constant 0 : index
    %c0_0 = arith.constant 0 : index
    %0 = vector.load %arg0[%c0, %c0_0] : memref<8x8xf32, #tpu.memory_space<vmem>>, vector<8x8xf32>
    %1 = arith.truncf %0 : vector<8x8xf32> to vector<8x8xbf16>
    %c0_1 = arith.constant 0 : index
    %c0_2 = arith.constant 0 : index
    %2 = vector.load %arg1[%c0_1, %c0_2] : memref<8x32xf32, #tpu.memory_space<vmem>>, vector<8x32xf32>
    %3 = arith.truncf %2 : vector<8x32xf32> to vector<8x32xbf16>
    %cst = arith.constant dense<0.000000e+00> : vector<8x32xf32>
    %4 = tpu.matmul %1, %3, %cst {dimension_numbers = #tpu.dot_dimension_numbers<[1], [0], [0], [1], [0, 0, 1, 1], [], []>} : vector<8x8xbf16>, vector<8x32xbf16>, vector<8x32xf32> -> vector<8x32xf32>
    %c0_3 = arith.constant 0 : index
    %c0_4 = arith.constant 0 : index
    %5 = vector.load %arg2[%c0_3, %c0_4] : memref<1x32xf32, #tpu.memory_space<vmem>>, vector<1x32xf32>
    %6 = vector.broadcast %5 : vector<1x32xf32> to vector<8x32xf32>
    %7 = arith.addf %4, %6 : vector<8x32xf32>
    %c0_5 = arith.constant 0 : index
    %c0_6 = arith.constant 0 : index
    %8 = vector.load %arg3[%c0_5, %c0_6] : memref<8x32xf32, #tpu.memory_space<vmem>>, vector<8x32xf32>
    tpu.vector_store %arg3[%c0_5, %c0_6], %7 {strides = array<i32>} : memref<8x32xf32, #tpu.memory_space<vmem>>, vector<8x32xf32>,
    return
  }
}

module attributes {stable_mosaic.version = 11 : i64} {
  func.func @_linear_kernel(%arg0: memref<8x8xf32, #tpu.memory_space<vmem>>, %arg1: memref<8x4xf32, #tpu.memory_space<vmem>>, %arg2: memref<1x4xf32, #tpu.memory_space<vmem>>, %arg3: memref<8x4xf32, #tpu.memory_space<vmem>>) attributes {dimension_semantics = [], scalar_prefetch = 0 : i64, scratch_operands = 0 : i64, tpu.core_type = #tpu.core_type<tc>} {
    %c0 = arith.constant 0 : index
    %c0_0 = arith.constant 0 : index
    %0 = vector.load %arg0[%c0, %c0_0] : memref<8x8xf32, #tpu.memory_space<vmem>>, vector<8x8xf32>
    %1 = arith.truncf %0 : vector<8x8xf32> to vector<8x8xbf16>
    %c0_1 = arith.constant 0 : index
    %c0_2 = arith.constant 0 : index
    %2 = vector.load %arg1[%c0_1, %c0_2] : memref<8x4xf32, #tpu.memory_space<vmem>>, vector<8x4xf32>
    %3 = arith.truncf %2 : vector<8x4xf32> to vector<8x4xbf16>
    %cst = arith.constant dense<0.000000e+00> : vector<8x4xf32>
    %4 = tpu.matmul %1, %3, %cst {dimension_numbers = #tpu.dot_dimension_numbers<[1], [0], [0], [1], [0, 0, 1, 1], [], []>} : vector<8x8xbf16>, vector<8x4xbf16>, vector<8x4xf32> -> vector<8x4xf32>
    %c0_3 = arith.constant 0 : index
    %c0_4 = arith.constant 0 : index
    %5 = vector.load %arg2[%c0_3, %c0_4] : memref<1x4xf32, #tpu.memory_space<vmem>>, vector<1x4xf32>
    %6 = vector.broadcast %5 : vector<1x4xf32> to vector<8x4xf32>
    %7 = arith.addf %4, %6 : vector<8x4xf32>
    %c0_5 = arith.constant 0 : index
    %c0_6 = arith.constant 0 : index
    %8 = vector.load %arg3[%c0_5, %c0_6] : memref<8x4xf32, #tpu.memory_space<vmem>>, vector<8x4xf32>
    tpu.vector_store %arg3[%c0_5, %c0_6], %7 {strides = array<i32>} : memref<8x4xf32, #tpu.memory_space<vmem>>, vector<8x4xf32>,
    return
  }
}

</mosaic_0001>

<bundles_post_ra>
// kernel: retriever_forward.50
= control target key start
LH: loop header
LB: loop body
LE: loop exit
PB: predicated region body
PF: predicated region fallthrough
CT: control target
= control target key end

     0   :  { %vm27_vm0 = vcmask 261120   ;;  %s92_s1 = inlined_call_operand.vmem [shape: f32[32,32], index: 1, kind: input, shape index: {}]   ;;  %s93_s0 = inlined_call_operand.vmem [shape: f32[8,32], index: 0, kind: input, shape index: {}]   ;;  %s94_s2 = inlined_call_operand.vmem [shape: f32[1,32], index: 2, kind: input, shape index: {}]   ;;  %s95_s3 = inlined_call_operand.vmem [shape: f32[8,32], index: 3, kind: output, shape index: {}]  }
   0x1   :  { %v19_v0 = vld [vmem:[%s92_s1 + $0x10] sm:$0xff]  ;;  %v20_v1 = vld [vmem:[%s92_s1 + $0x18] sm:$0xff]  ;;  %v17_v2 = vld [vmem:[%s92_s1] sm:$0xff] }
   0x2   :  { %v22_v3 = vpack.c.bf16 %v20_v1, %v19_v0  ;;  %v18_v4 = vld [vmem:[%s92_s1 + $0x8] sm:$0xff]  ;;  %v15_v6 = vld [vmem:[%s93_s0] sm:$0xff] }
   0x3   :  { %v21_v5 = vpack.c.bf16 %v18_v4, %v17_v2  ;;  %v16_v7 = vpack.c.bf16 %v15_v6, %v15_v6  ;;  %v50_v8 = vld [vmem:[%s94_s2] ss:$0 sm:$0xff] }
   0x4   :  { %37 = vmatpush.bf16.msra.mxu0 %v22_v3 }
   0x8   :  { %38 = vmatpush.bf16.msra.mxu0 %v21_v5 }
   0xb   :  { %49 = vmatmul.msk.bf16.vlgmr.msra.gmra.mxu0 %vm27_vm0, %v16_v7 }
  0x88   :  { %v40_v9 = vpop.f32.mrf.mxu0 }
  0x89   :  { %v41_v10 = vadd.f32 %v50_v8, %v40_v9 }
  0x8b   :  { %44 = vst.msk [vmem:[%s95_s3] sm:$0xff] %vm27_vm0, %v41_v10 }
  0x90   :  { %v42_v11 = vpop.f32.mrf.mxu0 }

// kernel: retriever_forward.43
= control target key start
LH: loop header
LB: loop body
LE: loop exit
PB: predicated region body
PF: predicated region fallthrough
CT: control target
= control target key end

     0   :  { %vm27_vm0 = vcmask 1041408   ;;  %vm23_vm1 = vcmask 31744   ;;  %vm44_vm2 = vcmask 261120   ;;  %s84_s1 = inlined_call_operand.vmem [shape: f32[4,32], index: 1, kind: input, shape index: {}]   ;;  %s85_s0 = inlined_call_operand.vmem [shape: f32[8,4], index: 0, kind: input, shape index: {}]   ;;  %s86_s2 = inlined_call_operand.vmem [shape: f32[1,32], index: 2, kind: input, shape index: {}]   ;;  %s87_s3 = inlined_call_operand.vmem [shape: f32[8,32], index: 3, kind: output, shape index: {}]  }
   0x1   :  { %v17_v0 = vld [vmem:[%s84_s1] sm:$0xf] }
   0x2   :  { %v15_v1 = vld [vmem:[%s85_s0] sm:$0xff]  ;;  %v18_v2 = vpack.c.bf16 %v17_v0, %v17_v0 }
   0x3   :  { %v16_v4 = vpack.c.bf16 %v15_v1, %v15_v1  ;;  %v51_v5 = vld [vmem:[%s86_s2] ss:$0 sm:$0xff] }
   0x4   :  { %v29_v3 = vsel %vm27_vm0, %v18_v2, 0 }
   0x5   :  { %38 = vmatpush.bf16.msra.mxu0 %v29_v3 }
   0x8   :  { %50 = vmatmul.msk.bf16.vlgmr.msra.gmra.mxu0 %vm23_vm1, %v16_v4 }
  0x85   :  { %v40_v6 = vpop.f32.mrf.mxu0 }
  0x86   :  { %v41_v7 = vadd.f32 %v51_v5, %v40_v6 }
  0x88   :  { %45 = vst.msk [vmem:[%s87_s3] sm:$0xff] %vm44_vm2, %v41_v7 }
  0x8d   :  { %v42_v8 = vpop.f32.mrf.mxu0 }

// kernel: retriever_forward.44
= control target key start
LH: loop header
LB: loop body
LE: loop exit
PB: predicated region body
PF: predicated region fallthrough
CT: control target
= control target key end

     0   :  { %vm27_vm0 = vcmask 261120   ;;  %vm44_vm1 = vcmask 523264   ;;  %s93_s1 = inlined_call_operand.vmem [shape: f32[32,64], index: 1, kind: input, shape index: {}]   ;;  %s94_s0 = inlined_call_operand.vmem [shape: f32[8,32], index: 0, kind: input, shape index: {}]   ;;  %s95_s2 = inlined_call_operand.vmem [shape: f32[1,64], index: 2, kind: input, shape index: {}]   ;;  %s96_s3 = inlined_call_operand.vmem [shape: f32[8,64], index: 3, kind: output, shape index: {}]  }
   0x1   :  { %v19_v0 = vld [vmem:[%s93_s1 + $0x10] sm:$0xff]  ;;  %v20_v1 = vld [vmem:[%s93_s1 + $0x18] sm:$0xff]  ;;  %v17_v2 = vld [vmem:[%s93_s1] sm:$0xff] }
   0x2   :  { %v22_v3 = vpack.c.bf16 %v20_v1, %v19_v0  ;;  %v18_v4 = vld [vmem:[%s93_s1 + $0x8] sm:$0xff]  ;;  %v15_v6 = vld [vmem:[%s94_s0] sm:$0xff] }
   0x3   :  { %v21_v5 = vpack.c.bf16 %v18_v4, %v17_v2  ;;  %v16_v7 = vpack.c.bf16 %v15_v6, %v15_v6  ;;  %v51_v8 = vld [vmem:[%s95_s2] ss:$0 sm:$0xff] }
   0x4   :  { %37 = vmatpush.bf16.msra.mxu0 %v22_v3 }
   0x8   :  { %38 = vmatpush.bf16.msra.mxu0 %v21_v5 }
   0xb   :  { %50 = vmatmul.msk.bf16.vlgmr.msra.gmra.mxu0 %vm27_vm0, %v16_v7 }
  0x88   :  { %v40_v9 = vpop.f32.mrf.mxu0 }
  0x89   :  { %v41_v10 = vadd.f32 %v51_v8, %v40_v9 }
  0x8b   :  { %45 = vst.msk [vmem:[%s96_s3] sm:$0xff] %vm44_vm1, %v41_v10 }
  0x90   :  { %v42_v11 = vpop.f32.mrf.mxu0 }

// kernel: retriever_forward.51
= control target key start
LH: loop header
LB: loop body
LE: loop exit
PB: predicated region body
PF: predicated region fallthrough
CT: control target
= control target key end

     0   :  { %vm27_vm0 = vcmask 261120   ;;  %vm44_vm1 = vcmask 785408   ;;  %s93_s1 = inlined_call_operand.vmem [shape: f32[32,96], index: 1, kind: input, shape index: {}]   ;;  %s94_s0 = inlined_call_operand.vmem [shape: f32[8,32], index: 0, kind: input, shape index: {}]   ;;  %s95_s2 = inlined_call_operand.vmem [shape: f32[1,96], index: 2, kind: input, shape index: {}]   ;;  %s96_s3 = inlined_call_operand.vmem [shape: f32[8,96], index: 3, kind: output, shape index: {}]  }
   0x1   :  { %v19_v0 = vld [vmem:[%s93_s1 + $0x10] sm:$0xff]  ;;  %v20_v1 = vld [vmem:[%s93_s1 + $0x18] sm:$0xff]  ;;  %v17_v2 = vld [vmem:[%s93_s1] sm:$0xff] }
   0x2   :  { %v22_v3 = vpack.c.bf16 %v20_v1, %v19_v0  ;;  %v18_v4 = vld [vmem:[%s93_s1 + $0x8] sm:$0xff]  ;;  %v15_v6 = vld [vmem:[%s94_s0] sm:$0xff] }
   0x3   :  { %v21_v5 = vpack.c.bf16 %v18_v4, %v17_v2  ;;  %v16_v7 = vpack.c.bf16 %v15_v6, %v15_v6  ;;  %v51_v8 = vld [vmem:[%s95_s2] ss:$0 sm:$0xff] }
   0x4   :  { %37 = vmatpush.bf16.msra.mxu0 %v22_v3 }
   0x8   :  { %38 = vmatpush.bf16.msra.mxu0 %v21_v5 }
   0xb   :  { %50 = vmatmul.msk.bf16.vlgmr.msra.gmra.mxu0 %vm27_vm0, %v16_v7 }
  0x88   :  { %v40_v9 = vpop.f32.mrf.mxu0 }
  0x89   :  { %v41_v10 = vadd.f32 %v51_v8, %v40_v9 }
  0x8b   :  { %45 = vst.msk [vmem:[%s96_s3] sm:$0xff] %vm44_vm1, %v41_v10 }
  0x90   :  { %v42_v11 = vpop.f32.mrf.mxu0 }

// kernel: retriever_forward.54
= control target key start
LH: loop header
LB: loop body
LE: loop exit
PB: predicated region body
PF: predicated region fallthrough
CT: control target
= control target key end

     0   :  { %vm33_vm0 = vcmask 261120   ;;  %vm68_vm1 = vcmask 523264   ;;  %s174_s1 = inlined_call_operand.vmem [shape: f32[32,64], index: 1, kind: input, shape index: {}]   ;;  %s175_s3 = inlined_call_operand.vmem [shape: f32[64,32], index: 3, kind: input, shape index: {}]   ;;  %s176_s0 = inlined_call_operand.vmem [shape: f32[8,32], index: 0, kind: input, shape index: {}]   ;;  %s177_s2 = inlined_call_operand.vmem [shape: f32[1,64], index: 2, kind: input, shape index: {}]   ;;  %s178_s4 = inlined_call_operand.vmem [shape: f32[1,32], index: 4, kind: input, shape index: {}]   ;;  %s179_s5 = inlined_call_operand.vmem [shape: f32[8,32], index: 5, kind: output, shape index: {}]  }
   0x1   :  { %v25_v0 = vld [vmem:[%s174_s1 + $0x10] sm:$0xff]  ;;  %v26_v1 = vld [vmem:[%s174_s1 + $0x18] sm:$0xff]  ;;  %v23_v2 = vld [vmem:[%s174_s1] sm:$0xff] }
   0x2   :  { %v28_v3 = vpack.c.bf16 %v26_v1, %v25_v0  ;;  %v24_v4 = vld [vmem:[%s174_s1 + $0x8] sm:$0xff]  ;;  %v58_v5 = vld [vmem:[%s175_s3 + $0x30] sm:$0xff]  ;;  %v59_v6 = vld [vmem:[%s175_s3 + $0x38] sm:$0xff] }
   0x3   :  { %v56_v7 = vld [vmem:[%s175_s3 + $0x20] sm:$0xff]  ;;  %v57_v8 = vld [vmem:[%s175_s3 + $0x28] sm:$0xff]  ;;  %v27_v9 = vpack.c.bf16 %v24_v4, %v23_v2  ;;  %v63_v11 = vpack.c.bf16 %v59_v6, %v58_v5  ;;  %v54_v14 = vld [vmem:[%s175_s3 + $0x10] sm:$0xff] }
   0x4   :  { %43 = vmatpush.bf16.msra.mxu0 %v28_v3  ;;  %v21_v10 = vld [vmem:[%s176_s0] sm:$0xff]  ;;  %v62_v12 = vpack.c.bf16 %v57_v8, %v56_v7  ;;  %v55_v15 = vld [vmem:[%s175_s3 + $0x18] sm:$0xff]  ;;  %v53_v18 = vld [vmem:[%s175_s3 + $0x8] sm:$0xff] }
   0x5   :  { %76 = vmatpush.bf16.msra.mxu1 %v63_v11  ;;  %v22_v13 = vpack.c.bf16 %v21_v10, %v21_v10  ;;  %v61_v16 = vpack.c.bf16 %v55_v15, %v54_v14  ;;  %v52_v17 = vld [vmem:[%s175_s3] sm:$0xff] }
   0x6   :  { %v60_v19 = vpack.c.bf16 %v53_v18, %v52_v17  ;;  %v92_v20 = vld [vmem:[%s177_s2] ss:$0 sm:$0xff] }
   0x7   :  { %v93_v26 = vld [vmem:[%s178_s4] ss:$0 sm:$0xff] }
   0x8   :  { %44 = vmatpush.bf16.msra.mxu0 %v27_v9 }
   0x9   :  { %77 = vmatpush.bf16.msra.mxu1 %v62_v12 }
   0xb   :  { %90 = vmatmul.msk.bf16.vlgmr.msra.gmra.mxu0 %vm33_vm0, %v22_v13 }
   0xd   :  { %78 = vmatpush.bf16.msra.mxu1 %v61_v16 }
  0x11   :  { %79 = vmatpush.bf16.msra.mxu1 %v60_v19 }
  0x88   :  { %v46_v21 = vpop.f32.mrf.mxu0 }
  0x89   :  { %v47_v22 = vadd.f32 %v92_v20, %v46_v21 }
  0x8b   :  { %v50_v23 = vmax.f32 %v47_v22, 0.0 }
  0x8d   :  { %v51_v24 = vpack.c.bf16 %v50_v23, %v50_v23 }
  0x8f   :  { %91 = vmatmul.msk.bf16.vlgmr.msra.gmra.mxu1 %vm68_vm1, %v51_v24 }
  0x90   :  { %v48_v25 = vpop.f32.mrf.mxu0 }
 0x10c   :  { %v81_v27 = vpop.f32.mrf.mxu1 }
 0x10d   :  { %v82_v28 = vadd.f32 %v93_v26, %v81_v27 }
 0x10f   :  { %85 = vst.msk [vmem:[%s179_s5] sm:$0xff] %vm33_vm0, %v82_v28 }
 0x114   :  { %v83_v29 = vpop.f32.mrf.mxu1 }

// kernel: retriever_forward.52
= control target key start
LH: loop header
LB: loop body
LE: loop exit
PB: predicated region body
PF: predicated region fallthrough
CT: control target
= control target key end

     0   :  { %s476_s18 = smov [#allocation3]   ;;  %s549_s0 = inlined_call_operand.vmem [shape: s32[2], index: 0, kind: input, shape index: {}]   ;;  %s550_s1 = inlined_call_operand.vmem [shape: f32[2,4,32], index: 1, kind: input, shape index: {}]   ;;  %s551_s2 = inlined_call_operand.vmem [shape: f32[2,4,32], index: 2, kind: input, shape index: {}]   ;;  %s552_s3 = inlined_call_operand.vmem [shape: f32[2,4,32], index: 3, kind: input, shape index: {}]   ;;  %s553_s4 = inlined_call_operand.vmem [shape: f32[2,4,32], index: 4, kind: output, shape index: {}]  }
   0x1   :  { %s10_s17 = sshll.u32 %s549_s0, 4  ;;  %s11_s17 = int_to_ptr.vmem [resolvable:$true] %s10_s17 }
   0x2   :  { %13 = dma.vmem_to_smem %s11_s17, 16, %s476_s18, [#allocation2] }
   0x3   :  { %470 = dma.done.wait [#allocation2], 16 }
   0x4   :  { %471 = vsyncadd [#allocation2], 4294967280 }
   0x5   :  { %16 = sfence }
   0x6   :  { %s508_s19 = smov 0  }
   0x7 LB: > { %s419_s20 = sadd.s32 4294967295, %s474_s19   ;;  %p423_p0 = scmp.ge.s32.totalorder %s474_s19, 1  ;;  %s474_s19 = sphi %s508_s19, %s22_s19  }
   0x8   : > { %p163_p1 = scmp.lt.s32.totalorder %s474_s19, 3 }
   0xa   : > { %p164_p2 = pnand %p423_p0, %p163_p1 }
   0xb   : > { %p193_p3 = scmp.lt.s32.totalorder (!%p164_p2), %s419_s20, 1  ;;  %s477_s28 = smov (!%p164_p2), 112  }
   0xc   : > { %167 = sbr.rel (%p164_p2) target bundleno = 787 (0x313), region = 32  ;;  %s210_s29 = sld [smem:[#allocation3 + %s419_s20]] (!%p164_p2) }
   0xd   : > { %s479_s7 = smov (!%p164_p2), 16  }
  0x11   : > { %s194_s0 = scalar_select %p193_p3, %s419_s20, 1  ;;  %vm222_vm0 = vcmask 130048   ;;  %v211_v10 = vlaneseq  ;;  %v478_v13 = vmov -1e+09   ;;  %vm242_vm2 = vcmask 27648  }
  0x12   : > { %v213_v12 = vstv %s210_s29  ;;  %vm259_vm3 = vcmask 1041408   ;;  %vm255_vm4 = vcmask 31744   ;;  %vm340_vm5 = vcmask 257024  }
  0x13   : > { %s516_s21 = sshll.u32 %s194_s0, 2  ;;  %v212_v11 = vand.u32 127, %v211_v10 }
  0x14   : > { %s200_s24 = scalar_lea.vmem %s551_s2, %s516_s21  ;;  %s196_s27 = scalar_lea.vmem %s550_s1, %s516_s21 }
  0x15   : > { %v217_v0 = vld [vmem:[%s200_s24] sm:$0xf]  ;;  %vm214_vm1 = vcmp.lt.s32.totalorder %v212_v11, %v213_v12  ;;  %s204_s6 = scalar_lea.vmem %s552_s3, %s516_s21  ;;  %s208_s10 = scalar_lea.vmem %s553_s4, %s516_s21 }
  0x16   : > { %v220_v1 = vpack.c.bf16 %v217_v0, %v217_v0  ;;  %v216_v2 = vld [vmem:[%s196_s27] sm:$0xf]  ;;  %v215_v14 = vsel %vm214_vm1, 0.0, %v478_v13 }
  0x17   : > { %v219_v3 = vpack.c.bf16 %v216_v2, %v216_v2  ;;  %v218_v31 = vld [vmem:[%s204_s6] sm:$0xf] }
  0x18   : > { %280 = vrot.lane.b32.xlu0 %v220_v1, %s477_s28  ;;  %v227_v4 = vsel %vm222_vm0, %v220_v1, 0  ;;  %v221_v32 = vpack.c.bf16 %v218_v31, %v218_v31 }
  0x19   : > { %236 = vmatpush.bf16.xpose.msra.mxu0 %v227_v4 }
  0x1a   : > { %v261_v33 = vsel %vm259_vm3, %v221_v32, 0 }
  0x1b   : > { %270 = vmatpush.bf16.msra.mxu1 %v261_v33 }
  0x20   : > { %277 = vrot.lane.b32.xlu0 %v219_v3, %s477_s28  ;;  %428 = vmatmul.msk.bf16.vlgmr.msra.gmra.mxu0 %vm222_vm0, %v219_v3 }
  0x8a   : > { %v281_v5 = vpop.permute.xlu0 %280 }
  0x8b   : > { %v286_v6 = vsel %vm222_vm0, %v281_v5, 0 }
  0x8c   : > { %295 = vmatpush.bf16.xpose.msra.mxu2 %v286_v6 }
  0x92   : > { %v278_v7 = vpop.permute.xlu0 %277 }
  0x93   : > { %430 = vmatmul.msk.bf16.vlgmr.msra.gmra.mxu2 %vm222_vm0, %v278_v7 }
  0x9d   : > { %v238_v8 = vpop.f32.mrf.mxu0 }
  0x9e   : > { %v239_v18 = vadd.f32 %v238_v8, %v215_v14 }
  0xa0   : > { %v243_v20 = vsel %vm242_vm2, %v239_v18, -inf }
  0xa5   : > { %v240_v9 = vpop.f32.mrf.mxu0 }
 0x116   : > { %v297_v15 = vpop.f32.mrf.mxu2 }
 0x117   : > { %v298_v16 = vadd.f32 %v297_v15, %v215_v14 }
 0x119   : > { %v301_v17 = vsel %vm242_vm2, %v298_v16, -inf }
 0x11a   : > { %302 = vmax.xlane.f32.xlu1 %v301_v17 }
 0x11e   : > { %v299_v19 = vpop.f32.mrf.mxu2 }
 0x122   : > { %244 = vmax.xlane.f32.xlu1 %v243_v20 }
 0x18d   : > { %v303_v21 = vpop.xlane.xlu1 %302 }
 0x18e   : > { %v304_v22 = vsub.f32 %v298_v16, %v303_v21 }
 0x190   : > { %v305_v23 = vmul.f32 1.442695, %v304_v22 }
 0x192   : > { %446 = vpow2.f32 %v305_v23 }
 0x195   : > { %v245_v24 = vpop.xlane.xlu1 %244 }
 0x196   : > { %v246_v25 = vsub.f32 %v239_v18, %v245_v24 }
 0x198   : > { %v447_v26 = vpop.eup %446  ;;  %v247_v27 = vmul.f32 1.442695, %v246_v25 }
 0x199   : > { %v307_v28 = vsel %vm242_vm2, %v447_v26, 0.0 }
 0x19a   : > { %448 = vpow2.f32 %v247_v27  ;;  %308 = vadd.xlane.f32.xlu2 %v307_v28 }
 0x1a0   : > { %v449_v29 = vpop.eup %448 }
 0x1a1   : > { %v249_v30 = vsel %vm242_vm2, %v449_v29, 0.0 }
 0x1a2   : > { %250 = vadd.xlane.f32.xlu0 %v249_v30 }
 0x1b2   : > { %314 = vrot.lane.b32.xlu2 %v221_v32, %s477_s28 }
 0x20d   : > { %v309_v34 = vpop.xlane.xlu2 %308 }
 0x20e   : > { %450 = vrcp.f32 %v309_v34 }
 0x214   : > { %v451_v35 = vpop.eup %450 }
 0x215   : > { %v315_v36 = vpop.permute.xlu2 %314  ;;  %v251_v37 = vpop.xlane.xlu0 %250  ;;  %v311_v38 = vmul.f32 %v451_v35, %v447_v26 }
 0x216   : > { %452 = vrcp.f32 %v251_v37  ;;  %v320_v39 = vsel %vm259_vm3, %v315_v36, 0 }
 0x217   : > { %329 = vmatpush.bf16.msra.mxu3 %v320_v39  ;;  %v312_v40 = vpack.c.bf16 %v311_v38, %v311_v38 }
 0x21a   : > { %431 = vmatmul.msk.bf16.vlgmr.msra.gmra.mxu3 %vm255_vm4, %v312_v40 }
 0x21c   : > { %v453_v41 = vpop.eup %452 }
 0x21d   : > { %v253_v42 = vmul.f32 %v453_v41, %v449_v29 }
 0x21f   : > { %v254_v43 = vpack.c.bf16 %v253_v42, %v253_v42 }
 0x221   : > { %429 = vmatmul.msk.bf16.vlgmr.msra.gmra.mxu1 %vm255_vm4, %v254_v43 }
 0x29d   : > { %v331_v44 = vpop.f32.mrf.mxu3 }
 0x29e   : > { %336 = vrot.lane.b32.xlu1 %v331_v44, %s479_s7  ;;  %v272_v45 = vpop.f32.mrf.mxu1 }
 0x2a5   : > { %v333_v46 = vpop.f32.mrf.mxu3 }
 0x2a6   : > { %v274_v47 = vpop.f32.mrf.mxu1 }
 0x310   : > { %v337_v48 = vpop.permute.xlu1 %336 }
 0x311   : > { %v339_v49 = vsel %vm222_vm0, %v272_v45, %v337_v48 }
 0x312   : > { %341 = vst.msk [vmem:[%s208_s10] sm:$0xf] %vm340_vm5, %v339_v49 }
 0x313 PF: > { %s22_s19 = sadd.s32 1, %s474_s19  }
 0x314   : > { %p19_p4 = scmp.ge.s32.totalorder %s22_s19, 4  }
 0x316   :  { %21 = sbr.rel (!%p19_p4) target bundleno = 7 (0x7), region = 68 }

// kernel: retriever_forward.42
= control target key start
LH: loop header
LB: loop body
LE: loop exit
PB: predicated region body
PF: predicated region fallthrough
CT: control target
= control target key end

     0   :  { %vm24_vm0 = vcmask 130048   ;;  %s83_s1 = inlined_call_operand.vmem [shape: f32[16,16], index: 1, kind: input, shape index: {}]   ;;  %s84_s0 = inlined_call_operand.vmem [shape: f32[8,16], index: 0, kind: input, shape index: {}]   ;;  %s85_s2 = inlined_call_operand.vmem [shape: f32[1,16], index: 2, kind: input, shape index: {}]   ;;  %s86_s3 = inlined_call_operand.vmem [shape: f32[8,16], index: 3, kind: output, shape index: {}]  }
   0x1   :  { %v17_v0 = vld [vmem:[%s83_s1] sm:$0xff]  ;;  %v18_v1 = vld [vmem:[%s83_s1 + $0x8] sm:$0xff] }
   0x2   :  { %v15_v2 = vld [vmem:[%s84_s0] sm:$0xff]  ;;  %v19_v3 = vpack.c.bf16 %v18_v1, %v17_v0 }
   0x3   :  { %v16_v4 = vpack.c.bf16 %v15_v2, %v15_v2  ;;  %v47_v5 = vld [vmem:[%s85_s2] ss:$0 sm:$0xff] }
   0x4   :  { %35 = vmatpush.bf16.msra.mxu0 %v19_v3 }
   0x7   :  { %46 = vmatmul.msk.bf16.vlgmr.msra.gmra.mxu0 %vm24_vm0, %v16_v4 }
  0x84   :  { %v37_v6 = vpop.f32.mrf.mxu0 }
  0x85   :  { %v38_v7 = vadd.f32 %v47_v5, %v37_v6 }
  0x87   :  { %41 = vst.msk [vmem:[%s86_s3] sm:$0xff] %vm24_vm0, %v38_v7 }
  0x8c   :  { %v39_v8 = vpop.f32.mrf.mxu0 }

// kernel: retriever_forward.46
= control target key start
LH: loop header
LB: loop body
LE: loop exit
PB: predicated region body
PF: predicated region fallthrough
CT: control target
= control target key end

     0   :  { %s476_s18 = smov [#allocation3]   ;;  %s549_s0 = inlined_call_operand.vmem [shape: s32[2], index: 0, kind: input, shape index: {}]   ;;  %s550_s1 = inlined_call_operand.vmem [shape: f32[2,4,16], index: 1, kind: input, shape index: {}]   ;;  %s551_s2 = inlined_call_operand.vmem [shape: f32[2,4,16], index: 2, kind: input, shape index: {}]   ;;  %s552_s3 = inlined_call_operand.vmem [shape: f32[2,4,16], index: 3, kind: input, shape index: {}]   ;;  %s553_s4 = inlined_call_operand.vmem [shape: f32[2,4,16], index: 4, kind: output, shape index: {}]  }
   0x1   :  { %s10_s17 = sshll.u32 %s549_s0, 4  ;;  %s11_s17 = int_to_ptr.vmem [resolvable:$true] %s10_s17 }
   0x2   :  { %13 = dma.vmem_to_smem %s11_s17, 16, %s476_s18, [#allocation2] }
   0x3   :  { %470 = dma.done.wait [#allocation2], 16 }
   0x4   :  { %471 = vsyncadd [#allocation2], 4294967280 }
   0x5   :  { %16 = sfence }
   0x6   :  { %s508_s19 = smov 0  }
   0x7 LB: > { %s419_s20 = sadd.s32 4294967295, %s474_s19   ;;  %p423_p0 = scmp.ge.s32.totalorder %s474_s19, 1  ;;  %s474_s19 = sphi %s508_s19, %s22_s19  }
   0x8   : > { %p163_p1 = scmp.lt.s32.totalorder %s474_s19, 3 }
   0xa   : > { %p164_p2 = pnand %p423_p0, %p163_p1 }
   0xb   : > { %p193_p3 = scmp.lt.s32.totalorder (!%p164_p2), %s419_s20, 1  ;;  %s477_s28 = smov (!%p164_p2), 120  }
   0xc   : > { %167 = sbr.rel (%p164_p2) target bundleno = 787 (0x313), region = 32  ;;  %s210_s29 = sld [smem:[#allocation3 + %s419_s20]] (!%p164_p2) }
   0xd   : > { %s479_s7 = smov (!%p164_p2), 8  }
  0x11   : > { %s194_s0 = scalar_select %p193_p3, %s419_s20, 1  ;;  %vm222_vm0 = vcmask 64512   ;;  %v211_v10 = vlaneseq  ;;  %v478_v13 = vmov -1e+09   ;;  %vm242_vm2 = vcmask 27648  }
  0x12   : > { %v213_v12 = vstv %s210_s29  ;;  %vm259_vm3 = vcmask 1041408   ;;  %vm255_vm4 = vcmask 31744   ;;  %vm340_vm5 = vcmask 125952  }
  0x13   : > { %s516_s21 = sshll.u32 %s194_s0, 2  ;;  %v212_v11 = vand.u32 127, %v211_v10 }
  0x14   : > { %s200_s24 = scalar_lea.vmem %s551_s2, %s516_s21  ;;  %s196_s27 = scalar_lea.vmem %s550_s1, %s516_s21 }
  0x15   : > { %v217_v0 = vld [vmem:[%s200_s24] sm:$0xf]  ;;  %vm214_vm1 = vcmp.lt.s32.totalorder %v212_v11, %v213_v12  ;;  %s204_s6 = scalar_lea.vmem %s552_s3, %s516_s21  ;;  %s208_s10 = scalar_lea.vmem %s553_s4, %s516_s21 }
  0x16   : > { %v220_v1 = vpack.c.bf16 %v217_v0, %v217_v0  ;;  %v216_v2 = vld [vmem:[%s196_s27] sm:$0xf]  ;;  %v215_v14 = vsel %vm214_vm1, 0.0, %v478_v13 }
  0x17   : > { %v219_v3 = vpack.c.bf16 %v216_v2, %v216_v2  ;;  %v218_v31 = vld [vmem:[%s204_s6] sm:$0xf] }
  0x18   : > { %280 = vrot.lane.b32.xlu0 %v220_v1, %s477_s28  ;;  %v227_v4 = vsel %vm222_vm0, %v220_v1, 0  ;;  %v221_v32 = vpack.c.bf16 %v218_v31, %v218_v31 }
  0x19   : > { %236 = vmatpush.bf16.xpose.msra.mxu0 %v227_v4 }
  0x1a   : > { %v261_v33 = vsel %vm259_vm3, %v221_v32, 0 }
  0x1b   : > { %270 = vmatpush.bf16.msra.mxu1 %v261_v33 }
  0x20   : > { %277 = vrot.lane.b32.xlu0 %v219_v3, %s477_s28  ;;  %428 = vmatmul.msk.bf16.vlgmr.msra.gmra.mxu0 %vm222_vm0, %v219_v3 }
  0x8a   : > { %v281_v5 = vpop.permute.xlu0 %280 }
  0x8b   : > { %v286_v6 = vsel %vm222_vm0, %v281_v5, 0 }
  0x8c   : > { %295 = vmatpush.bf16.xpose.msra.mxu2 %v286_v6 }
  0x92   : > { %v278_v7 = vpop.permute.xlu0 %277 }
  0x93   : > { %430 = vmatmul.msk.bf16.vlgmr.msra.gmra.mxu2 %vm222_vm0, %v278_v7 }
  0x9d   : > { %v238_v8 = vpop.f32.mrf.mxu0 }
  0x9e   : > { %v239_v18 = vadd.f32 %v238_v8, %v215_v14 }
  0xa0   : > { %v243_v20 = vsel %vm242_vm2, %v239_v18, -inf }
  0xa5   : > { %v240_v9 = vpop.f32.mrf.mxu0 }
 0x116   : > { %v297_v15 = vpop.f32.mrf.mxu2 }
 0x117   : > { %v298_v16 = vadd.f32 %v297_v15, %v215_v14 }
 0x119   : > { %v301_v17 = vsel %vm242_vm2, %v298_v16, -inf }
 0x11a   : > { %302 = vmax.xlane.f32.xlu1 %v301_v17 }
 0x11e   : > { %v299_v19 = vpop.f32.mrf.mxu2 }
 0x122   : > { %244 = vmax.xlane.f32.xlu1 %v243_v20 }
 0x18d   : > { %v303_v21 = vpop.xlane.xlu1 %302 }
 0x18e   : > { %v304_v22 = vsub.f32 %v298_v16, %v303_v21 }
 0x190   : > { %v305_v23 = vmul.f32 1.442695, %v304_v22 }
 0x192   : > { %446 = vpow2.f32 %v305_v23 }
 0x195   : > { %v245_v24 = vpop.xlane.xlu1 %244 }
 0x196   : > { %v246_v25 = vsub.f32 %v239_v18, %v245_v24 }
 0x198   : > { %v447_v26 = vpop.eup %446  ;;  %v247_v27 = vmul.f32 1.442695, %v246_v25 }
 0x199   : > { %v307_v28 = vsel %vm242_vm2, %v447_v26, 0.0 }
 0x19a   : > { %448 = vpow2.f32 %v247_v27  ;;  %308 = vadd.xlane.f32.xlu2 %v307_v28 }
 0x1a0   : > { %v449_v29 = vpop.eup %448 }
 0x1a1   : > { %v249_v30 = vsel %vm242_vm2, %v449_v29, 0.0 }
 0x1a2   : > { %250 = vadd.xlane.f32.xlu0 %v249_v30 }
 0x1b2   : > { %314 = vrot.lane.b32.xlu2 %v221_v32, %s477_s28 }
 0x20d   : > { %v309_v34 = vpop.xlane.xlu2 %308 }
 0x20e   : > { %450 = vrcp.f32 %v309_v34 }
 0x214   : > { %v451_v35 = vpop.eup %450 }
 0x215   : > { %v315_v36 = vpop.permute.xlu2 %314  ;;  %v251_v37 = vpop.xlane.xlu0 %250  ;;  %v311_v38 = vmul.f32 %v451_v35, %v447_v26 }
 0x216   : > { %452 = vrcp.f32 %v251_v37  ;;  %v320_v39 = vsel %vm259_vm3, %v315_v36, 0 }
 0x217   : > { %329 = vmatpush.bf16.msra.mxu3 %v320_v39  ;;  %v312_v40 = vpack.c.bf16 %v311_v38, %v311_v38 }
 0x21a   : > { %431 = vmatmul.msk.bf16.vlgmr.msra.gmra.mxu3 %vm255_vm4, %v312_v40 }
 0x21c   : > { %v453_v41 = vpop.eup %452 }
 0x21d   : > { %v253_v42 = vmul.f32 %v453_v41, %v449_v29 }
 0x21f   : > { %v254_v43 = vpack.c.bf16 %v253_v42, %v253_v42 }
 0x221   : > { %429 = vmatmul.msk.bf16.vlgmr.msra.gmra.mxu1 %vm255_vm4, %v254_v43 }
 0x29d   : > { %v331_v44 = vpop.f32.mrf.mxu3 }
 0x29e   : > { %336 = vrot.lane.b32.xlu1 %v331_v44, %s479_s7  ;;  %v272_v45 = vpop.f32.mrf.mxu1 }
 0x2a5   : > { %v333_v46 = vpop.f32.mrf.mxu3 }
 0x2a6   : > { %v274_v47 = vpop.f32.mrf.mxu1 }
 0x310   : > { %v337_v48 = vpop.permute.xlu1 %336 }
 0x311   : > { %v339_v49 = vsel %vm222_vm0, %v272_v45, %v337_v48 }
 0x312   : > { %341 = vst.msk [vmem:[%s208_s10] sm:$0xf] %vm340_vm5, %v339_v49 }
 0x313 PF: > { %s22_s19 = sadd.s32 1, %s474_s19  }
 0x314   : > { %p19_p4 = scmp.ge.s32.totalorder %s22_s19, 4  }
 0x316   :  { %21 = sbr.rel (!%p19_p4) target bundleno = 7 (0x7), region = 68 }

// kernel: custom-call.11
= control target key start
LH: loop header
LB: loop body
LE: loop exit
PB: predicated region body
PF: predicated region fallthrough
CT: control target
= control target key end

     0   :  { %s6_s0 = inlined_call_operand.vmem [shape: f32[4,2,32], index: 0, kind: output, shape index: {}]  }

// kernel: retriever_forward.48
= control target key start
LH: loop header
LB: loop body
LE: loop exit
PB: predicated region body
PF: predicated region fallthrough
CT: control target
= control target key end

     0   :  { %vm30_vm0 = vcmask 130048   ;;  %vm59_vm1 = vcmask 261120   ;;  %s147_s1 = inlined_call_operand.vmem [shape: f32[16,32], index: 1, kind: input, shape index: {}]   ;;  %s148_s0 = inlined_call_operand.vmem [shape: f32[8,16], index: 0, kind: input, shape index: {}]   ;;  %s149_s2 = inlined_call_operand.vmem [shape: f32[1,32], index: 2, kind: input, shape index: {}]   ;;  %s150_s4 = inlined_call_operand.vmem [shape: f32[1,16], index: 4, kind: input, shape index: {}]   ;;  %s151_s3 = inlined_call_operand.vmem [shape: f32[32,16], index: 3, kind: input, shape index: {}]   ;;  %s152_s5 = inlined_call_operand.vmem [shape: f32[8,16], index: 5, kind: output, shape index: {}]  }
   0x1   :  { %v23_v0 = vld [vmem:[%s147_s1] sm:$0xff]  ;;  %v24_v1 = vld [vmem:[%s147_s1 + $0x8] sm:$0xff]  ;;  %v51_v5 = vld [vmem:[%s151_s3 + $0x10] sm:$0xff] }
   0x2   :  { %v21_v2 = vld [vmem:[%s148_s0] sm:$0xff]  ;;  %v25_v3 = vpack.c.bf16 %v24_v1, %v23_v0  ;;  %v52_v6 = vld [vmem:[%s151_s3 + $0x18] sm:$0xff]  ;;  %v50_v9 = vld [vmem:[%s151_s3 + $0x8] sm:$0xff] }
   0x3   :  { %v22_v4 = vpack.c.bf16 %v21_v2, %v21_v2  ;;  %v54_v7 = vpack.c.bf16 %v52_v6, %v51_v5  ;;  %v49_v8 = vld [vmem:[%s151_s3] sm:$0xff] }
   0x4   :  { %41 = vmatpush.bf16.msra.mxu0 %v25_v3  ;;  %v53_v10 = vpack.c.bf16 %v50_v9, %v49_v8  ;;  %v83_v11 = vld [vmem:[%s149_s2] ss:$0 sm:$0xff] }
   0x5   :  { %69 = vmatpush.bf16.msra.mxu1 %v54_v7  ;;  %v84_v17 = vld [vmem:[%s150_s4] ss:$0 sm:$0xff] }
   0x7   :  { %81 = vmatmul.msk.bf16.vlgmr.msra.gmra.mxu0 %vm30_vm0, %v22_v4 }
   0x9   :  { %70 = vmatpush.bf16.msra.mxu1 %v53_v10 }
  0x84   :  { %v43_v12 = vpop.f32.mrf.mxu0 }
  0x85   :  { %v44_v13 = vadd.f32 %v83_v11, %v43_v12 }
  0x87   :  { %v47_v14 = vmax.f32 %v44_v13, 0.0 }
  0x89   :  { %v48_v15 = vpack.c.bf16 %v47_v14, %v47_v14 }
  0x8b   :  { %82 = vmatmul.msk.bf16.vlgmr.msra.gmra.mxu1 %vm59_vm1, %v48_v15 }
  0x8c   :  { %v45_v16 = vpop.f32.mrf.mxu0 }
 0x108   :  { %v72_v18 = vpop.f32.mrf.mxu1 }
 0x109   :  { %v73_v19 = vadd.f32 %v84_v17, %v72_v18 }
 0x10b   :  { %76 = vst.msk [vmem:[%s152_s5] sm:$0xff] %vm30_vm0, %v73_v19 }
 0x110   :  { %v74_v20 = vpop.f32.mrf.mxu1 }

// kernel: custom-call.10
= control target key start
LH: loop header
LB: loop body
LE: loop exit
PB: predicated region body
PF: predicated region fallthrough
CT: control target
= control target key end

     0   :  { %s6_s0 = inlined_call_operand.vmem [shape: s32[4,2], index: 0, kind: output, shape index: {}]  }

// kernel: retriever_forward.49
= control target key start
LH: loop header
LB: loop body
LE: loop exit
PB: predicated region body
PF: predicated region fallthrough
CT: control target
= control target key end

     0   :  { %vm24_vm0 = vcmask 130048   ;;  %vm41_vm1 = vcmask 254976   ;;  %s84_s1 = inlined_call_operand.vmem [shape: f32[16,32], index: 1, kind: input, shape index: {}]   ;;  %s85_s0 = inlined_call_operand.vmem [shape: f32[2,16], index: 0, kind: input, shape index: {}]   ;;  %s86_s2 = inlined_call_operand.vmem [shape: f32[1,32], index: 2, kind: input, shape index: {}]   ;;  %s87_s3 = inlined_call_operand.vmem [shape: f32[2,32], index: 3, kind: output, shape index: {}]  }
   0x1   :  { %v17_v0 = vld [vmem:[%s84_s1] sm:$0xff]  ;;  %v18_v1 = vld [vmem:[%s84_s1 + $0x8] sm:$0xff] }
   0x2   :  { %v15_v2 = vld [vmem:[%s85_s0] sm:$0x3]  ;;  %v19_v3 = vpack.c.bf16 %v18_v1, %v17_v0 }
   0x3   :  { %v16_v4 = vpack.c.bf16 %v15_v2, %v15_v2  ;;  %v48_v5 = vld [vmem:[%s86_s2] ss:$0 sm:$0xff] }
   0x4   :  { %35 = vmatpush.bf16.msra.mxu0 %v19_v3 }
   0x7   :  { %47 = vmatmul.msk.bf16.vlgmr.msra.gmra.mxu0 %vm24_vm0, %v16_v4 }
  0x84   :  { %v37_v6 = vpop.f32.mrf.mxu0 }
  0x85   :  { %v38_v7 = vadd.f32 %v48_v5, %v37_v6 }
  0x87   :  { %42 = vst.msk [vmem:[%s87_s3] sm:$0x3] %vm41_vm1, %v38_v7 }
  0x8c   :  { %v39_v8 = vpop.f32.mrf.mxu0 }

// kernel: closed_call.103
= control target key start
LH: loop header
LB: loop body
LE: loop exit
PB: predicated region body
PF: predicated region fallthrough
CT: control target
= control target key end

     0   :  { %vm27_vm0 = vcmask 261120   ;;  %vm44_vm1 = vcmask 254976   ;;  %s93_s1 = inlined_call_operand.vmem [shape: f32[32,32], index: 1, kind: input, shape index: {}]   ;;  %s94_s0 = inlined_call_operand.vmem [shape: f32[2,32], index: 0, kind: input, shape index: {}]   ;;  %s95_s2 = inlined_call_operand.vmem [shape: f32[1,32], index: 2, kind: input, shape index: {}]   ;;  %s96_s3 = inlined_call_operand.vmem [shape: f32[2,32], index: 3, kind: output, shape index: {}]  }
   0x1   :  { %v19_v0 = vld [vmem:[%s93_s1 + $0x10] sm:$0xff]  ;;  %v20_v1 = vld [vmem:[%s93_s1 + $0x18] sm:$0xff]  ;;  %v17_v2 = vld [vmem:[%s93_s1] sm:$0xff] }
   0x2   :  { %v22_v3 = vpack.c.bf16 %v20_v1, %v19_v0  ;;  %v18_v4 = vld [vmem:[%s93_s1 + $0x8] sm:$0xff]  ;;  %v15_v6 = vld [vmem:[%s94_s0] sm:$0x3] }
   0x3   :  { %v21_v5 = vpack.c.bf16 %v18_v4, %v17_v2  ;;  %v16_v7 = vpack.c.bf16 %v15_v6, %v15_v6  ;;  %v51_v8 = vld [vmem:[%s95_s2] ss:$0 sm:$0xff] }
   0x4   :  { %37 = vmatpush.bf16.msra.mxu0 %v22_v3 }
   0x8   :  { %38 = vmatpush.bf16.msra.mxu0 %v21_v5 }
   0xb   :  { %50 = vmatmul.msk.bf16.vlgmr.msra.gmra.mxu0 %vm27_vm0, %v16_v7 }
  0x88   :  { %v40_v9 = vpop.f32.mrf.mxu0 }
  0x89   :  { %v41_v10 = vadd.f32 %v51_v8, %v40_v9 }
  0x8b   :  { %45 = vst.msk [vmem:[%s96_s3] sm:$0x3] %vm44_vm1, %v41_v10 }
  0x90   :  { %v42_v11 = vpop.f32.mrf.mxu0 }

// kernel: retriever_forward.41
= control target key start
LH: loop header
LB: loop body
LE: loop exit
PB: predicated region body
PF: predicated region fallthrough
CT: control target
= control target key end

     0   :  { %vm21_vm0 = vcmask 130048   ;;  %vm38_vm1 = vcmask 253952   ;;  %s80_s1 = inlined_call_operand.vmem [shape: f32[16,32], index: 1, kind: input, shape index: {}]   ;;  %s81_s0 = inlined_call_operand.vmem [shape: f32[1,16], index: 0, kind: input, shape index: {}]   ;;  %s82_s2 = inlined_call_operand.vmem [shape: f32[1,32], index: 2, kind: input, shape index: {}]   ;;  %s83_s3 = inlined_call_operand.vmem [shape: f32[1,32], index: 3, kind: output, shape index: {}]  }
   0x1   :  { %v17_v0 = vld [vmem:[%s80_s1] sm:$0xff]  ;;  %v18_v1 = vld [vmem:[%s80_s1 + $0x8] sm:$0xff] }
   0x2   :  { %v15_v2 = vld [vmem:[%s81_s0] sm:$0x1]  ;;  %v19_v3 = vpack.c.bf16 %v18_v1, %v17_v0 }
   0x3   :  { %v16_v4 = vpack.c.bf16 %v15_v2, %v15_v2  ;;  %v20_v5 = vld [vmem:[%s82_s2] sm:$0x1] }
   0x4   :  { %32 = vmatpush.bf16.msra.mxu0 %v19_v3 }
   0x7   :  { %44 = vmatmul.msk.bf16.vlgmr.msra.gmra.mxu0 %vm21_vm0, %v16_v4 }
  0x84   :  { %v34_v6 = vpop.f32.mrf.mxu0 }
  0x85   :  { %v35_v7 = vadd.f32 %v34_v6, %v20_v5 }
  0x87   :  { %39 = vst.msk [vmem:[%s83_s3] sm:$0x1] %vm38_vm1, %v35_v7 }
  0x8c   :  { %v36_v8 = vpop.f32.mrf.mxu0 }

// kernel: closed_call.104
= control target key start
LH: loop header
LB: loop body
LE: loop exit
PB: predicated region body
PF: predicated region fallthrough
CT: control target
= control target key end

     0   :  { %vm27_vm0 = vcmask 261120   ;;  %vm44_vm1 = vcmask 779264   ;;  %s93_s1 = inlined_call_operand.vmem [shape: f32[32,96], index: 1, kind: input, shape index: {}]   ;;  %s94_s0 = inlined_call_operand.vmem [shape: f32[2,32], index: 0, kind: input, shape index: {}]   ;;  %s95_s2 = inlined_call_operand.vmem [shape: f32[1,96], index: 2, kind: input, shape index: {}]   ;;  %s96_s3 = inlined_call_operand.vmem [shape: f32[2,96], index: 3, kind: output, shape index: {}]  }
   0x1   :  { %v19_v0 = vld [vmem:[%s93_s1 + $0x10] sm:$0xff]  ;;  %v20_v1 = vld [vmem:[%s93_s1 + $0x18] sm:$0xff]  ;;  %v17_v2 = vld [vmem:[%s93_s1] sm:$0xff] }
   0x2   :  { %v22_v3 = vpack.c.bf16 %v20_v1, %v19_v0  ;;  %v18_v4 = vld [vmem:[%s93_s1 + $0x8] sm:$0xff]  ;;  %v15_v6 = vld [vmem:[%s94_s0] sm:$0x3] }
   0x3   :  { %v21_v5 = vpack.c.bf16 %v18_v4, %v17_v2  ;;  %v16_v7 = vpack.c.bf16 %v15_v6, %v15_v6  ;;  %v51_v8 = vld [vmem:[%s95_s2] ss:$0 sm:$0xff] }
   0x4   :  { %37 = vmatpush.bf16.msra.mxu0 %v22_v3 }
   0x8   :  { %38 = vmatpush.bf16.msra.mxu0 %v21_v5 }
   0xb   :  { %50 = vmatmul.msk.bf16.vlgmr.msra.gmra.mxu0 %vm27_vm0, %v16_v7 }
  0x88   :  { %v40_v9 = vpop.f32.mrf.mxu0 }
  0x89   :  { %v41_v10 = vadd.f32 %v51_v8, %v40_v9 }
  0x8b   :  { %45 = vst.msk [vmem:[%s96_s3] sm:$0x3] %vm44_vm1, %v41_v10 }
  0x90   :  { %v42_v11 = vpop.f32.mrf.mxu0 }

// kernel: closed_call.105
= control target key start
LH: loop header
LB: loop body
LE: loop exit
PB: predicated region body
PF: predicated region fallthrough
CT: control target
= control target key end

     0   :  { %s464_s18 = smov [#allocation3]   ;;  %s541_s0 = inlined_call_operand.vmem [shape: s32[2], index: 0, kind: input, shape index: {}]   ;;  %s542_s1 = inlined_call_operand.vmem [shape: f32[2,1,32], index: 1, kind: input, shape index: {}]   ;;  %s543_s2 = inlined_call_operand.vmem [shape: f32[2,5,32], index: 2, kind: input, shape index: {}]   ;;  %s544_s3 = inlined_call_operand.vmem [shape: f32[2,5,32], index: 3, kind: input, shape index: {}]   ;;  %s545_s4 = inlined_call_operand.vmem [shape: f32[2,1,32], index: 4, kind: output, shape index: {}]  }
   0x1   :  { %s10_s17 = sshll.u32 %s541_s0, 4  ;;  %s11_s17 = int_to_ptr.vmem [resolvable:$true] %s10_s17 }
   0x2   :  { %13 = dma.vmem_to_smem %s11_s17, 16, %s464_s18, [#allocation2] }
   0x3   :  { %458 = dma.done.wait [#allocation2], 16 }
   0x4   :  { %459 = vsyncadd [#allocation2], 4294967280 }
   0x5   :  { %16 = sfence }
   0x6   :  { %s497_s19 = smov 0  }
   0x7 LB: > { %s408_s20 = sadd.s32 4294967295, %s462_s19   ;;  %p412_p0 = scmp.ge.s32.totalorder %s462_s19, 1  ;;  %s462_s19 = sphi %s497_s19, %s22_s19  }
   0x8   : > { %p162_p1 = scmp.lt.s32.totalorder %s462_s19, 3 }
   0xa   : > { %p163_p2 = pnand %p412_p0, %p162_p1 }
   0xb   : > { %p190_p3 = scmp.lt.s32.totalorder (!%p163_p2), %s408_s20, 1  ;;  %s465_s28 = smov (!%p163_p2), 112  }
   0xc   : > { %166 = sbr.rel (%p163_p2) target bundleno = 788 (0x314), region = 32  ;;  %s205_s29 = sld [smem:[#allocation3 + %s408_s20]] (!%p163_p2) }
   0xd   : > { %s468_s7 = smov (!%p163_p2), 16  }
  0x11   : > { %s505_s0 = scalar_select %p190_p3, %s408_s20, 1  ;;  %vm217_vm0 = vcmask 130048   ;;  %v206_v10 = vlaneseq  ;;  %v466_v13 = vmov -1e+09   ;;  %vm237_vm2 = vcmask 32768  }
  0x12   : > { %v208_v12 = vstv %s205_s29  ;;  %vm254_vm3 = vcmask 1041408   ;;  %vm255_vm4 = vcmask 1042432   ;;  %v467_v33 = vmov 65535  }
  0x13   : > { %s413_s21 = sshll.u32 %s505_s0, 3  ;;  %s192_s27 = scalar_lea.vmem %s542_s1, %s505_s0  ;;  %v207_v11 = vand.u32 127, %v206_v10  ;;  %v256_v34 = vsel %vm254_vm3, 4294967295, %v467_v33  ;;  %vm250_vm5 = vcmask 39936   ;;  %vm338_vm6 = vcmask 253952  }
  0x14   : > { %s196_s24 = scalar_lea.vmem %s543_s2, %s413_s21  ;;  %v211_v2 = vld [vmem:[%s192_s27] sm:$0x1]  ;;  %s200_s6 = scalar_lea.vmem %s544_s3, %s413_s21  ;;  %v257_v35 = vsel %vm255_vm4, %v256_v34, 0 }
  0x15   : > { %v212_v0 = vld [vmem:[%s196_s24] sm:$0x1f]  ;;  %v214_v3 = vpack.c.bf16 %v211_v2, %v211_v2  ;;  %vm209_vm1 = vcmp.lt.s32.totalorder %v207_v11, %v208_v12  ;;  %s203_s10 = scalar_lea.vmem %s545_s4, %s505_s0 }
  0x16   : > { %v215_v1 = vpack.c.bf16 %v212_v0, %v212_v0  ;;  %v210_v14 = vsel %vm209_vm1, 0.0, %v466_v13  ;;  %v213_v31 = vld [vmem:[%s200_s6] sm:$0x1f] }
  0x17   : > { %v216_v32 = vpack.c.bf16 %v213_v31, %v213_v31 }
  0x18   : > { %278 = vrot.lane.b32.xlu0 %v215_v1, %s465_s28  ;;  %v222_v4 = vsel %vm217_vm0, %v215_v1, 0 }
  0x19   : > { %231 = vmatpush.bf16.xpose.msra.mxu0 %v222_v4  ;;  %v259_v36 = vand.u32 %v257_v35, %v216_v32 }
  0x1b   : > { %268 = vmatpush.bf16.msra.mxu1 %v259_v36 }
  0x20   : > { %275 = vrot.lane.b32.xlu0 %v214_v3, %s465_s28  ;;  %415 = vmatmul.msk.bf16.vlgmr.msra.gmra.mxu0 %vm217_vm0, %v214_v3 }
  0x8a   : > { %v279_v5 = vpop.permute.xlu0 %278 }
  0x8b   : > { %v284_v6 = vsel %vm217_vm0, %v279_v5, 0 }
  0x8c   : > { %293 = vmatpush.bf16.xpose.msra.mxu2 %v284_v6 }
  0x92   : > { %v276_v7 = vpop.permute.xlu0 %275 }
  0x93   : > { %417 = vmatmul.msk.bf16.vlgmr.msra.gmra.mxu2 %vm217_vm0, %v276_v7 }
  0x9d   : > { %v233_v8 = vpop.f32.mrf.mxu0 }
  0x9e   : > { %v234_v18 = vadd.f32 %v233_v8, %v210_v14 }
  0xa0   : > { %v238_v20 = vsel %vm237_vm2, %v234_v18, -inf }
  0xa5   : > { %v235_v9 = vpop.f32.mrf.mxu0 }
 0x116   : > { %v295_v15 = vpop.f32.mrf.mxu2 }
 0x117   : > { %v296_v16 = vadd.f32 %v295_v15, %v210_v14 }
 0x119   : > { %v299_v17 = vsel %vm237_vm2, %v296_v16, -inf }
 0x11a   : > { %300 = vmax.xlane.f32.xlu1 %v299_v17 }
 0x11e   : > { %v297_v19 = vpop.f32.mrf.mxu2 }
 0x122   : > { %239 = vmax.xlane.f32.xlu1 %v238_v20 }
 0x18d   : > { %v301_v21 = vpop.xlane.xlu1 %300 }
 0x18e   : > { %v302_v22 = vsub.f32 %v296_v16, %v301_v21 }
 0x190   : > { %v303_v23 = vmul.f32 1.442695, %v302_v22 }
 0x192   : > { %434 = vpow2.f32 %v303_v23 }
 0x195   : > { %v240_v24 = vpop.xlane.xlu1 %239 }
 0x196   : > { %v241_v25 = vsub.f32 %v234_v18, %v240_v24 }
 0x198   : > { %v435_v26 = vpop.eup %434  ;;  %v242_v27 = vmul.f32 1.442695, %v241_v25 }
 0x199   : > { %v305_v28 = vsel %vm237_vm2, %v435_v26, 0.0 }
 0x19a   : > { %436 = vpow2.f32 %v242_v27  ;;  %306 = vadd.xlane.f32.xlu2 %v305_v28 }
 0x1a0   : > { %v437_v29 = vpop.eup %436 }
 0x1a1   : > { %v244_v30 = vsel %vm237_vm2, %v437_v29, 0.0 }
 0x1a2   : > { %245 = vadd.xlane.f32.xlu0 %v244_v30 }
 0x1b2   : > { %312 = vrot.lane.b32.xlu2 %v216_v32, %s465_s28 }
 0x20d   : > { %v307_v37 = vpop.xlane.xlu2 %306 }
 0x20e   : > { %438 = vrcp.f32 %v307_v37 }
 0x214   : > { %v439_v38 = vpop.eup %438 }
 0x215   : > { %v313_v39 = vpop.permute.xlu2 %312  ;;  %v246_v40 = vpop.xlane.xlu0 %245  ;;  %v309_v41 = vmul.f32 %v439_v38, %v435_v26 }
 0x216   : > { %440 = vrcp.f32 %v246_v40  ;;  %v318_v42 = vand.u32 %v313_v39, %v257_v35 }
 0x217   : > { %v310_v43 = vpack.c.bf16 %v309_v41, %v309_v41 }
 0x218   : > { %327 = vmatpush.bf16.msra.mxu3 %v318_v42 }
 0x21b   : > { %418 = vmatmul.msk.bf16.vlgmr.msra.gmra.mxu3 %vm250_vm5, %v310_v43 }
 0x21c   : > { %v441_v44 = vpop.eup %440 }
 0x21d   : > { %v248_v45 = vmul.f32 %v441_v44, %v437_v29 }
 0x21f   : > { %v249_v46 = vpack.c.bf16 %v248_v45, %v248_v45 }
 0x221   : > { %416 = vmatmul.msk.bf16.vlgmr.msra.gmra.mxu1 %vm250_vm5, %v249_v46 }
 0x29e   : > { %v270_v47 = vpop.f32.mrf.mxu1  ;;  %v329_v48 = vpop.f32.mrf.mxu3 }
 0x29f   : > { %334 = vrot.lane.b32.xlu1 %v329_v48, %s468_s7 }
 0x2a6   : > { %v272_v49 = vpop.f32.mrf.mxu1  ;;  %v331_v50 = vpop.f32.mrf.mxu3 }
 0x311   : > { %v335_v51 = vpop.permute.xlu1 %334 }
 0x312   : > { %v337_v52 = vsel %vm217_vm0, %v270_v47, %v335_v51 }
 0x313   : > { %339 = vst.msk [vmem:[%s203_s10] sm:$0x1] %vm338_vm6, %v337_v52 }
 0x314 PF: > { %s22_s19 = sadd.s32 1, %s462_s19  }
 0x315   : > { %p19_p4 = scmp.ge.s32.totalorder %s22_s19, 4  }
 0x317   :  { %21 = sbr.rel (!%p19_p4) target bundleno = 7 (0x7), region = 68 }

// kernel: closed_call.111
= control target key start
LH: loop header
LB: loop body
LE: loop exit
PB: predicated region body
PF: predicated region fallthrough
CT: control target
= control target key end

     0   :  { %vm27_vm0 = vcmask 261120   ;;  %vm44_vm1 = vcmask 517120   ;;  %s93_s1 = inlined_call_operand.vmem [shape: f32[32,64], index: 1, kind: input, shape index: {}]   ;;  %s94_s0 = inlined_call_operand.vmem [shape: f32[2,32], index: 0, kind: input, shape index: {}]   ;;  %s95_s2 = inlined_call_operand.vmem [shape: f32[1,64], index: 2, kind: input, shape index: {}]   ;;  %s96_s3 = inlined_call_operand.vmem [shape: f32[2,64], index: 3, kind: output, shape index: {}]  }
   0x1   :  { %v19_v0 = vld [vmem:[%s93_s1 + $0x10] sm:$0xff]  ;;  %v20_v1 = vld [vmem:[%s93_s1 + $0x18] sm:$0xff]  ;;  %v17_v2 = vld [vmem:[%s93_s1] sm:$0xff] }
   0x2   :  { %v22_v3 = vpack.c.bf16 %v20_v1, %v19_v0  ;;  %v18_v4 = vld [vmem:[%s93_s1 + $0x8] sm:$0xff]  ;;  %v15_v6 = vld [vmem:[%s94_s0] sm:$0x3] }
   0x3   :  { %v21_v5 = vpack.c.bf16 %v18_v4, %v17_v2  ;;  %v16_v7 = vpack.c.bf16 %v15_v6, %v15_v6  ;;  %v51_v8 = vld [vmem:[%s95_s2] ss:$0 sm:$0xff] }
   0x4   :  { %37 = vmatpush.bf16.msra.mxu0 %v22_v3 }
   0x8   :  { %38 = vmatpush.bf16.msra.mxu0 %v21_v5 }
   0xb   :  { %50 = vmatmul.msk.bf16.vlgmr.msra.gmra.mxu0 %vm27_vm0, %v16_v7 }
  0x88   :  { %v40_v9 = vpop.f32.mrf.mxu0 }
  0x89   :  { %v41_v10 = vadd.f32 %v51_v8, %v40_v9 }
  0x8b   :  { %45 = vst.msk [vmem:[%s96_s3] sm:$0x3] %vm44_vm1, %v41_v10 }
  0x90   :  { %v42_v11 = vpop.f32.mrf.mxu0 }

// kernel: closed_call.110
= control target key start
LH: loop header
LB: loop body
LE: loop exit
PB: predicated region body
PF: predicated region fallthrough
CT: control target
= control target key end

     0   :  { %vm33_vm0 = vcmask 261120   ;;  %vm68_vm1 = vcmask 523264   ;;  %vm85_vm2 = vcmask 254976   ;;  %s173_s1 = inlined_call_operand.vmem [shape: f32[32,64], index: 1, kind: input, shape index: {}]   ;;  %s174_s3 = inlined_call_operand.vmem [shape: f32[64,32], index: 3, kind: input, shape index: {}]   ;;  %s175_s0 = inlined_call_operand.vmem [shape: f32[2,32], index: 0, kind: input, shape index: {}]   ;;  %s176_s2 = inlined_call_operand.vmem [shape: f32[1,64], index: 2, kind: input, shape index: {}]   ;;  %s177_s4 = inlined_call_operand.vmem [shape: f32[1,32], index: 4, kind: input, shape index: {}]   ;;  %s178_s5 = inlined_call_operand.vmem [shape: f32[2,32], index: 5, kind: output, shape index: {}]  }
   0x1   :  { %v25_v0 = vld [vmem:[%s173_s1 + $0x10] sm:$0xff]  ;;  %v26_v1 = vld [vmem:[%s173_s1 + $0x18] sm:$0xff]  ;;  %v23_v2 = vld [vmem:[%s173_s1] sm:$0xff] }
   0x2   :  { %v28_v3 = vpack.c.bf16 %v26_v1, %v25_v0  ;;  %v24_v4 = vld [vmem:[%s173_s1 + $0x8] sm:$0xff]  ;;  %v58_v5 = vld [vmem:[%s174_s3 + $0x30] sm:$0xff]  ;;  %v59_v6 = vld [vmem:[%s174_s3 + $0x38] sm:$0xff] }
   0x3   :  { %v56_v7 = vld [vmem:[%s174_s3 + $0x20] sm:$0xff]  ;;  %v57_v8 = vld [vmem:[%s174_s3 + $0x28] sm:$0xff]  ;;  %v27_v9 = vpack.c.bf16 %v24_v4, %v23_v2  ;;  %v63_v11 = vpack.c.bf16 %v59_v6, %v58_v5  ;;  %v54_v14 = vld [vmem:[%s174_s3 + $0x10] sm:$0xff] }
   0x4   :  { %43 = vmatpush.bf16.msra.mxu0 %v28_v3  ;;  %v21_v10 = vld [vmem:[%s175_s0] sm:$0x3]  ;;  %v62_v12 = vpack.c.bf16 %v57_v8, %v56_v7  ;;  %v55_v15 = vld [vmem:[%s174_s3 + $0x18] sm:$0xff]  ;;  %v53_v18 = vld [vmem:[%s174_s3 + $0x8] sm:$0xff] }
   0x5   :  { %76 = vmatpush.bf16.msra.mxu1 %v63_v11  ;;  %v22_v13 = vpack.c.bf16 %v21_v10, %v21_v10  ;;  %v61_v16 = vpack.c.bf16 %v55_v15, %v54_v14  ;;  %v52_v17 = vld [vmem:[%s174_s3] sm:$0xff] }
   0x6   :  { %v60_v19 = vpack.c.bf16 %v53_v18, %v52_v17  ;;  %v93_v20 = vld [vmem:[%s176_s2] ss:$0 sm:$0xff] }
   0x7   :  { %v94_v26 = vld [vmem:[%s177_s4] ss:$0 sm:$0xff] }
   0x8   :  { %44 = vmatpush.bf16.msra.mxu0 %v27_v9 }
   0x9   :  { %77 = vmatpush.bf16.msra.mxu1 %v62_v12 }
   0xb   :  { %91 = vmatmul.msk.bf16.vlgmr.msra.gmra.mxu0 %vm33_vm0, %v22_v13 }
   0xd   :  { %78 = vmatpush.bf16.msra.mxu1 %v61_v16 }
  0x11   :  { %79 = vmatpush.bf16.msra.mxu1 %v60_v19 }
  0x88   :  { %v46_v21 = vpop.f32.mrf.mxu0 }
  0x89   :  { %v47_v22 = vadd.f32 %v93_v20, %v46_v21 }
  0x8b   :  { %v50_v23 = vmax.f32 %v47_v22, 0.0 }
  0x8d   :  { %v51_v24 = vpack.c.bf16 %v50_v23, %v50_v23 }
  0x8f   :  { %92 = vmatmul.msk.bf16.vlgmr.msra.gmra.mxu1 %vm68_vm1, %v51_v24 }
  0x90   :  { %v48_v25 = vpop.f32.mrf.mxu0 }
 0x10c   :  { %v81_v27 = vpop.f32.mrf.mxu1 }
 0x10d   :  { %v82_v28 = vadd.f32 %v94_v26, %v81_v27 }
 0x10f   :  { %86 = vst.msk [vmem:[%s178_s5] sm:$0x3] %vm85_vm2, %v82_v28 }
 0x114   :  { %v83_v29 = vpop.f32.mrf.mxu1 }

// kernel: closed_call.108
= control target key start
LH: loop header
LB: loop body
LE: loop exit
PB: predicated region body
PF: predicated region fallthrough
CT: control target
= control target key end

     0   :  { %s460_s18 = smov [#allocation3]   ;;  %s536_s0 = inlined_call_operand.vmem [shape: s32[2], index: 0, kind: input, shape index: {}]   ;;  %s537_s1 = inlined_call_operand.vmem [shape: f32[2,1,32], index: 1, kind: input, shape index: {}]   ;;  %s538_s2 = inlined_call_operand.vmem [shape: f32[2,4,32], index: 2, kind: input, shape index: {}]   ;;  %s539_s3 = inlined_call_operand.vmem [shape: f32[2,4,32], index: 3, kind: input, shape index: {}]   ;;  %s540_s4 = inlined_call_operand.vmem [shape: f32[2,1,32], index: 4, kind: output, shape index: {}]  }
   0x1   :  { %s10_s17 = sshll.u32 %s536_s0, 4  ;;  %s11_s17 = int_to_ptr.vmem [resolvable:$true] %s10_s17 }
   0x2   :  { %13 = dma.vmem_to_smem %s11_s17, 16, %s460_s18, [#allocation2] }
   0x3   :  { %454 = dma.done.wait [#allocation2], 16 }
   0x4   :  { %455 = vsyncadd [#allocation2], 4294967280 }
   0x5   :  { %16 = sfence }
   0x6   :  { %s492_s19 = smov 0  }
   0x7 LB: > { %s405_s20 = sadd.s32 4294967295, %s458_s19   ;;  %p409_p0 = scmp.ge.s32.totalorder %s458_s19, 1  ;;  %s458_s19 = sphi %s492_s19, %s22_s19  }
   0x8   : > { %p162_p1 = scmp.lt.s32.totalorder %s458_s19, 3 }
   0xa   : > { %p163_p2 = pnand %p409_p0, %p162_p1 }
   0xb   : > { %p190_p3 = scmp.lt.s32.totalorder (!%p163_p2), %s405_s20, 1  ;;  %s461_s28 = smov (!%p163_p2), 112  }
   0xc   : > { %166 = sbr.rel (%p163_p2) target bundleno = 787 (0x313), region = 32  ;;  %s205_s29 = sld [smem:[#allocation3 + %s405_s20]] (!%p163_p2) }
   0xd   : > { %s463_s7 = smov (!%p163_p2), 16  }
  0x11   : > { %s500_s0 = scalar_select %p190_p3, %s405_s20, 1  ;;  %vm217_vm0 = vcmask 130048   ;;  %v206_v10 = vlaneseq  ;;  %v462_v13 = vmov -1e+09   ;;  %vm237_vm2 = vcmask 24576  }
  0x12   : > { %v208_v12 = vstv %s205_s29  ;;  %vm254_vm3 = vcmask 1041408   ;;  %vm250_vm4 = vcmask 31744   ;;  %vm335_vm5 = vcmask 253952  }
  0x13   : > { %s410_s21 = sshll.u32 %s500_s0, 2  ;;  %s192_s27 = scalar_lea.vmem %s537_s1, %s500_s0  ;;  %v207_v11 = vand.u32 127, %v206_v10 }
  0x14   : > { %s196_s24 = scalar_lea.vmem %s538_s2, %s410_s21  ;;  %v211_v2 = vld [vmem:[%s192_s27] sm:$0x1]  ;;  %s200_s6 = scalar_lea.vmem %s539_s3, %s410_s21 }
  0x15   : > { %v212_v0 = vld [vmem:[%s196_s24] sm:$0xf]  ;;  %v214_v3 = vpack.c.bf16 %v211_v2, %v211_v2  ;;  %vm209_vm1 = vcmp.lt.s32.totalorder %v207_v11, %v208_v12  ;;  %s203_s10 = scalar_lea.vmem %s540_s4, %s500_s0 }
  0x16   : > { %v215_v1 = vpack.c.bf16 %v212_v0, %v212_v0  ;;  %v210_v14 = vsel %vm209_vm1, 0.0, %v462_v13  ;;  %v213_v31 = vld [vmem:[%s200_s6] sm:$0xf] }
  0x17   : > { %v216_v32 = vpack.c.bf16 %v213_v31, %v213_v31 }
  0x18   : > { %275 = vrot.lane.b32.xlu0 %v215_v1, %s461_s28  ;;  %v222_v4 = vsel %vm217_vm0, %v215_v1, 0 }
  0x19   : > { %231 = vmatpush.bf16.xpose.msra.mxu0 %v222_v4  ;;  %v256_v33 = vsel %vm254_vm3, %v216_v32, 0 }
  0x1a   : > { %265 = vmatpush.bf16.msra.mxu1 %v256_v33 }
  0x20   : > { %272 = vrot.lane.b32.xlu0 %v214_v3, %s461_s28  ;;  %412 = vmatmul.msk.bf16.vlgmr.msra.gmra.mxu0 %vm217_vm0, %v214_v3 }
  0x8a   : > { %v276_v5 = vpop.permute.xlu0 %275 }
  0x8b   : > { %v281_v6 = vsel %vm217_vm0, %v276_v5, 0 }
  0x8c   : > { %290 = vmatpush.bf16.xpose.msra.mxu2 %v281_v6 }
  0x92   : > { %v273_v7 = vpop.permute.xlu0 %272 }
  0x93   : > { %414 = vmatmul.msk.bf16.vlgmr.msra.gmra.mxu2 %vm217_vm0, %v273_v7 }
  0x9d   : > { %v233_v8 = vpop.f32.mrf.mxu0 }
  0x9e   : > { %v234_v18 = vadd.f32 %v233_v8, %v210_v14 }
  0xa0   : > { %v238_v20 = vsel %vm237_vm2, %v234_v18, -inf }
  0xa5   : > { %v235_v9 = vpop.f32.mrf.mxu0 }
 0x116   : > { %v292_v15 = vpop.f32.mrf.mxu2 }
 0x117   : > { %v293_v16 = vadd.f32 %v292_v15, %v210_v14 }
 0x119   : > { %v296_v17 = vsel %vm237_vm2, %v293_v16, -inf }
 0x11a   : > { %297 = vmax.xlane.f32.xlu1 %v296_v17 }
 0x11e   : > { %v294_v19 = vpop.f32.mrf.mxu2 }
 0x122   : > { %239 = vmax.xlane.f32.xlu1 %v238_v20 }
 0x18d   : > { %v298_v21 = vpop.xlane.xlu1 %297 }
 0x18e   : > { %v299_v22 = vsub.f32 %v293_v16, %v298_v21 }
 0x190   : > { %v300_v23 = vmul.f32 1.442695, %v299_v22 }
 0x192   : > { %430 = vpow2.f32 %v300_v23 }
 0x195   : > { %v240_v24 = vpop.xlane.xlu1 %239 }
 0x196   : > { %v241_v25 = vsub.f32 %v234_v18, %v240_v24 }
 0x198   : > { %v431_v26 = vpop.eup %430  ;;  %v242_v27 = vmul.f32 1.442695, %v241_v25 }
 0x199   : > { %v302_v28 = vsel %vm237_vm2, %v431_v26, 0.0 }
 0x19a   : > { %432 = vpow2.f32 %v242_v27  ;;  %303 = vadd.xlane.f32.xlu2 %v302_v28 }
 0x1a0   : > { %v433_v29 = vpop.eup %432 }
 0x1a1   : > { %v244_v30 = vsel %vm237_vm2, %v433_v29, 0.0 }
 0x1a2   : > { %245 = vadd.xlane.f32.xlu0 %v244_v30 }
 0x1b2   : > { %309 = vrot.lane.b32.xlu2 %v216_v32, %s461_s28 }
 0x20d   : > { %v304_v34 = vpop.xlane.xlu2 %303 }
 0x20e   : > { %434 = vrcp.f32 %v304_v34 }
 0x214   : > { %v435_v35 = vpop.eup %434 }
 0x215   : > { %v310_v36 = vpop.permute.xlu2 %309  ;;  %v246_v37 = vpop.xlane.xlu0 %245  ;;  %v306_v38 = vmul.f32 %v435_v35, %v431_v26 }
 0x216   : > { %436 = vrcp.f32 %v246_v37  ;;  %v315_v39 = vsel %vm254_vm3, %v310_v36, 0 }
 0x217   : > { %324 = vmatpush.bf16.msra.mxu3 %v315_v39  ;;  %v307_v40 = vpack.c.bf16 %v306_v38, %v306_v38 }
 0x21a   : > { %415 = vmatmul.msk.bf16.vlgmr.msra.gmra.mxu3 %vm250_vm4, %v307_v40 }
 0x21c   : > { %v437_v41 = vpop.eup %436 }
 0x21d   : > { %v248_v42 = vmul.f32 %v437_v41, %v433_v29 }
 0x21f   : > { %v249_v43 = vpack.c.bf16 %v248_v42, %v248_v42 }
 0x221   : > { %413 = vmatmul.msk.bf16.vlgmr.msra.gmra.mxu1 %vm250_vm4, %v249_v43 }
 0x29d   : > { %v326_v44 = vpop.f32.mrf.mxu3 }
 0x29e   : > { %331 = vrot.lane.b32.xlu1 %v326_v44, %s463_s7  ;;  %v267_v45 = vpop.f32.mrf.mxu1 }
 0x2a5   : > { %v328_v46 = vpop.f32.mrf.mxu3 }
 0x2a6   : > { %v269_v47 = vpop.f32.mrf.mxu1 }
 0x310   : > { %v332_v48 = vpop.permute.xlu1 %331 }
 0x311   : > { %v334_v49 = vsel %vm217_vm0, %v267_v45, %v332_v48 }
 0x312   : > { %336 = vst.msk [vmem:[%s203_s10] sm:$0x1] %vm335_vm5, %v334_v49 }
 0x313 PF: > { %s22_s19 = sadd.s32 1, %s458_s19  }
 0x314   : > { %p19_p4 = scmp.ge.s32.totalorder %s22_s19, 4  }
 0x316   :  { %21 = sbr.rel (!%p19_p4) target bundleno = 7 (0x7), region = 68 }

// kernel: closed_call.112
= control target key start
LH: loop header
LB: loop body
LE: loop exit
PB: predicated region body
PF: predicated region fallthrough
CT: control target
= control target key end

     0   :  { %vm27_vm0 = vcmask 1043456   ;;  %vm23_vm1 = vcmask 64512   ;;  %vm44_vm2 = vcmask 254976   ;;  %s84_s1 = inlined_call_operand.vmem [shape: f32[8,32], index: 1, kind: input, shape index: {}]   ;;  %s85_s0 = inlined_call_operand.vmem [shape: f32[2,8], index: 0, kind: input, shape index: {}]   ;;  %s86_s2 = inlined_call_operand.vmem [shape: f32[1,32], index: 2, kind: input, shape index: {}]   ;;  %s87_s3 = inlined_call_operand.vmem [shape: f32[2,32], index: 3, kind: output, shape index: {}]  }
   0x1   :  { %v17_v0 = vld [vmem:[%s84_s1] sm:$0xff] }
   0x2   :  { %v15_v1 = vld [vmem:[%s85_s0] sm:$0x3]  ;;  %v18_v2 = vpack.c.bf16 %v17_v0, %v17_v0 }
   0x3   :  { %v16_v4 = vpack.c.bf16 %v15_v1, %v15_v1  ;;  %v51_v5 = vld [vmem:[%s86_s2] ss:$0 sm:$0xff] }
   0x4   :  { %v29_v3 = vsel %vm27_vm0, %v18_v2, 0 }
   0x5   :  { %38 = vmatpush.bf16.msra.mxu0 %v29_v3 }
   0x8   :  { %50 = vmatmul.msk.bf16.vlgmr.msra.gmra.mxu0 %vm23_vm1, %v16_v4 }
  0x85   :  { %v40_v6 = vpop.f32.mrf.mxu0 }
  0x86   :  { %v41_v7 = vadd.f32 %v51_v5, %v40_v6 }
  0x88   :  { %45 = vst.msk [vmem:[%s87_s3] sm:$0x3] %vm44_vm2, %v41_v7 }
  0x8d   :  { %v42_v8 = vpop.f32.mrf.mxu0 }

// kernel: retriever_forward.57
= control target key start
LH: loop header
LB: loop body
LE: loop exit
PB: predicated region body
PF: predicated region fallthrough
CT: control target
= control target key end

     0   :  { %vm24_vm0 = vcmask 130048   ;;  %vm41_vm1 = vcmask 123904   ;;  %s84_s1 = inlined_call_operand.vmem [shape: f32[16,16], index: 1, kind: input, shape index: {}]   ;;  %s85_s0 = inlined_call_operand.vmem [shape: f32[2,16], index: 0, kind: input, shape index: {}]   ;;  %s86_s2 = inlined_call_operand.vmem [shape: f32[1,16], index: 2, kind: input, shape index: {}]   ;;  %s87_s3 = inlined_call_operand.vmem [shape: f32[2,16], index: 3, kind: output, shape index: {}]  }
   0x1   :  { %v17_v0 = vld [vmem:[%s84_s1] sm:$0xff]  ;;  %v18_v1 = vld [vmem:[%s84_s1 + $0x8] sm:$0xff] }
   0x2   :  { %v15_v2 = vld [vmem:[%s85_s0] sm:$0x3]  ;;  %v19_v3 = vpack.c.bf16 %v18_v1, %v17_v0 }
   0x3   :  { %v16_v4 = vpack.c.bf16 %v15_v2, %v15_v2  ;;  %v48_v5 = vld [vmem:[%s86_s2] ss:$0 sm:$0xff] }
   0x4   :  { %35 = vmatpush.bf16.msra.mxu0 %v19_v3 }
   0x7   :  { %47 = vmatmul.msk.bf16.vlgmr.msra.gmra.mxu0 %vm24_vm0, %v16_v4 }
  0x84   :  { %v37_v6 = vpop.f32.mrf.mxu0 }
  0x85   :  { %v38_v7 = vadd.f32 %v48_v5, %v37_v6 }
  0x87   :  { %42 = vst.msk [vmem:[%s87_s3] sm:$0x3] %vm41_vm1, %v38_v7 }
  0x8c   :  { %v39_v8 = vpop.f32.mrf.mxu0 }

// kernel: retriever_forward.70
= control target key start
LH: loop header
LB: loop body
LE: loop exit
PB: predicated region body
PF: predicated region fallthrough
CT: control target
= control target key end

     0   :  { %vm27_vm0 = vcmask 1043456   ;;  %vm23_vm1 = vcmask 64512   ;;  %vm44_vm2 = vcmask 261120   ;;  %s84_s1 = inlined_call_operand.vmem [shape: f32[8,32], index: 1, kind: input, shape index: {}]   ;;  %s85_s0 = inlined_call_operand.vmem [shape: f32[8,8], index: 0, kind: input, shape index: {}]   ;;  %s86_s2 = inlined_call_operand.vmem [shape: f32[1,32], index: 2, kind: input, shape index: {}]   ;;  %s87_s3 = inlined_call_operand.vmem [shape: f32[8,32], index: 3, kind: output, shape index: {}]  }
   0x1   :  { %v17_v0 = vld [vmem:[%s84_s1] sm:$0xff] }
   0x2   :  { %v15_v1 = vld [vmem:[%s85_s0] sm:$0xff]  ;;  %v18_v2 = vpack.c.bf16 %v17_v0, %v17_v0 }
   0x3   :  { %v16_v4 = vpack.c.bf16 %v15_v1, %v15_v1  ;;  %v51_v5 = vld [vmem:[%s86_s2] ss:$0 sm:$0xff] }
   0x4   :  { %v29_v3 = vsel %vm27_vm0, %v18_v2, 0 }
   0x5   :  { %38 = vmatpush.bf16.msra.mxu0 %v29_v3 }
   0x8   :  { %50 = vmatmul.msk.bf16.vlgmr.msra.gmra.mxu0 %vm23_vm1, %v16_v4 }
  0x85   :  { %v40_v6 = vpop.f32.mrf.mxu0 }
  0x86   :  { %v41_v7 = vadd.f32 %v51_v5, %v40_v6 }
  0x88   :  { %45 = vst.msk [vmem:[%s87_s3] sm:$0xff] %vm44_vm2, %v41_v7 }
  0x8d   :  { %v42_v8 = vpop.f32.mrf.mxu0 }

// kernel: retriever_forward.81
= control target key start
LH: loop header
LB: loop body
LE: loop exit
PB: predicated region body
PF: predicated region fallthrough
CT: control target
= control target key end

     0   :  { %vm27_vm0 = vcmask 1043456   ;;  %vm23_vm1 = vcmask 64512   ;;  %vm44_vm2 = vcmask 31744   ;;  %s84_s1 = inlined_call_operand.vmem [shape: f32[8,4], index: 1, kind: input, shape index: {}]   ;;  %s85_s0 = inlined_call_operand.vmem [shape: f32[8,8], index: 0, kind: input, shape index: {}]   ;;  %s86_s2 = inlined_call_operand.vmem [shape: f32[1,4], index: 2, kind: input, shape index: {}]   ;;  %s87_s3 = inlined_call_operand.vmem [shape: f32[8,4], index: 3, kind: output, shape index: {}]  }
   0x1   :  { %v17_v0 = vld [vmem:[%s84_s1] sm:$0xff] }
   0x2   :  { %v15_v1 = vld [vmem:[%s85_s0] sm:$0xff]  ;;  %v18_v2 = vpack.c.bf16 %v17_v0, %v17_v0 }
   0x3   :  { %v16_v4 = vpack.c.bf16 %v15_v1, %v15_v1  ;;  %v51_v5 = vld [vmem:[%s86_s2] ss:$0 sm:$0xff] }
   0x4   :  { %v29_v3 = vsel %vm27_vm0, %v18_v2, 0 }
   0x5   :  { %38 = vmatpush.bf16.msra.mxu0 %v29_v3 }
   0x8   :  { %50 = vmatmul.msk.bf16.vlgmr.msra.gmra.mxu0 %vm23_vm1, %v16_v4 }
  0x85   :  { %v40_v6 = vpop.f32.mrf.mxu0 }
  0x86   :  { %v41_v7 = vadd.f32 %v51_v5, %v40_v6 }
  0x88   :  { %45 = vst.msk [vmem:[%s87_s3] sm:$0xff] %vm44_vm2, %v41_v7 }
  0x8d   :  { %v42_v8 = vpop.f32.mrf.mxu0 }

</bundles_post_ra>
